<compile_context>
chip_gen: v7x
topology: tpu7x:2x2x1
jax: 0.10.0
libtpu: 0.0.40
codegen_flags: <defaults>
</compile_context>

<pallas_src>
import functools

import jax
import jax.numpy as jnp
from jax.experimental import pallas as pl
from jax.experimental.pallas import tpu as pltpu


# ---------------------------------------------------------------------------
# Pallas kernel: whole BasicBlock for one batch element.
# ---------------------------------------------------------------------------

def _basic_block_kernel(x_ref, mask_ref, w1_ref, s1_ref, b1_ref,
                        w2_ref, s2_ref, b2_ref, *rest,
                        off1, off2, sc_off, mq, store_off, has_down):
    """x_ref:   [P1, Cin]  flat tap source (padded / parity-decomposed input), f32
       mask_ref:[MQ, 1]    1.0 for valid output columns, 0.0 for the 2 junk columns per row
       w1/w2:   [9, *, planes] bf16 per-tap weights;  s*/b*: [1, planes] folded BN affine
       rest:    (+ ws/ss/bs if downsample) o_ref [MQ, planes],
                xb scratch [P1, Cin] f32, mid scratch [P2, planes] f32
    """
    if has_down:
        ws_ref, ss_ref, bs_ref, o_ref, xb_ref, mid_ref = rest
    else:
        o_ref, xb_ref, mid_ref = rest

    planes = o_ref.shape[-1]
    f32 = jnp.float32
    bf16 = jnp.bfloat16

    # x = relu(x): applied once to the flat source (zero padding is relu-invariant).
    xb_ref[...] = jnp.maximum(x_ref[...], 0.0)

    # ---- conv1 (3x3, stride folded into the static tap offsets) + bn1 + relu ----
    acc = jnp.zeros((mq, planes), f32)
    for t in range(9):
        lhs = xb_ref[pl.ds(off1[t], mq), :].astype(bf16)
        acc = acc + jnp.dot(lhs, w1_ref[t], preferred_element_type=f32)
    mid = jnp.maximum(acc * s1_ref[...] + b1_ref[...], 0.0) * mask_ref[...]

    # Scatter conv1's output into a zero-padded flat layout so conv2 reuses the same
    # shifted-GEMM scheme.  store_off is sublane-aligned; junk columns were masked to 0
    # so the padding ring of the conv2 source stays zero.
    mid_ref[...] = jnp.zeros(mid_ref.shape, mid_ref.dtype)
    mid_ref[pl.ds(store_off, mq), :] = mid

    # ---- conv2 (3x3, stride 1) + bn2 ----
    acc2 = jnp.zeros((mq, planes), f32)
    for t in range(9):
        lhs = mid_ref[pl.ds(off2[t], mq), :].astype(bf16)
        acc2 = acc2 + jnp.dot(lhs, w2_ref[t], preferred_element_type=f32)
    out = acc2 * s2_ref[...] + b2_ref[...]

    # ---- shortcut on relu(x): 1x1 conv + bn (downsample) or identity ----
    if has_down:
        lhs = xb_ref[pl.ds(sc_off, mq), :].astype(bf16)
        sc = jnp.dot(lhs, ws_ref[...], preferred_element_type=f32)
        sc = sc * ss_ref[...] + bs_ref[...]
    else:
        sc = xb_ref[pl.ds(sc_off, mq), :]          # identity shortcut: exact f32 relu(x)

    # residual add -- the reference BasicBlock has NO ReLU after the add.
    o_ref[...] = (out + sc).astype(o_ref.dtype)


# ---------------------------------------------------------------------------
# Wrapper-side layout: flatten so every 3x3 tap is a contiguous row-window.
# ---------------------------------------------------------------------------

def _conv_source(x_nhwc, stride):
    """Flatten the padded (and, for stride 2, parity-decomposed) NHWC input so that every
    3x3 tap and the 1x1 shortcut become contiguous row-windows at static element offsets."""
    B, H, W, C = x_nhwc.shape
    ho = (H - 1) // stride + 1
    wo = (W - 1) // stride + 1
    rowq = wo + 2                           # output rows carry 2 junk columns (discarded later)
    mq = ho * rowq
    if stride == 1:
        xp = jnp.pad(x_nhwc, ((0, 0), (1, 1), (1, 1), (0, 0)))
        flat = xp.reshape(B, (H + 2) * (W + 2), C)
        off1 = tuple(ky * rowq + kx for ky in range(3) for kx in range(3))
        sc_off = rowq + 1                   # reads x[ho, wo] itself (identity / 1x1 stride-1)
    elif stride == 2:
        if H % 2 or W % 2:
            raise NotImplementedError("stride-2 path assumes even spatial dims")
        xp = jnp.pad(x_nhwc, ((0, 0), (1, 1), (1, 3), (0, 0)))       # [B, H+2, W+4, C]
        parts = [xp[:, a::2, b::2, :].reshape(B, (ho + 1) * rowq, C)
                 for a in range(2) for b in range(2)]
        flat = jnp.concatenate(parts, axis=1)                        # 4 parity planes
        ps = (ho + 1) * rowq
        off1 = tuple(((ky % 2) * 2 + (kx % 2)) * ps + (ky // 2) * rowq + (kx // 2)
                     for ky in range(3) for kx in range(3))
        sc_off = 3 * ps                     # parity plane (1,1)[ho, wo] == x[2ho, 2wo]
    else:
        raise NotImplementedError("BasicBlock only uses stride 1 or 2")
    need = max(off1 + (sc_off,)) + mq       # keep every (even junk) read in-bounds
    p1 = -(-max(flat.shape[1], need) // 8) * 8
    if p1 > flat.shape[1]:
        flat = jnp.pad(flat, ((0, 0), (0, p1 - flat.shape[1]), (0, 0)))
    return flat, off1, sc_off, ho, wo, mq, rowq


@functools.partial(jax.jit, static_argnames=("stride",))
def basic_block_forward(x_nchw, params, stride):
    """Pallas forward of BasicBlock.  x: [B, Cin, H, W] -> [B, planes, Ho, Wo] (f32, NCHW)."""
    x = jnp.transpose(x_nchw, (0, 2, 3, 1)).astype(jnp.float32)      # NCHW -> NHWC
    B, H, W, cin = x.shape
    planes = params["w1"].shape[-1]
    has_down = "ws" in params

    flat, off1, sc_off, ho, wo, mq, rowq = _conv_source(x, stride)
    p1 = flat.shape[1]

    # conv2 source layout: zero-padded conv1 output, held in a VMEM scratch.
    lead = (-(rowq + 1)) % 8                        # sublane-align the bulk store
    store_off = lead + rowq + 1
    off2 = tuple(lead + ky * rowq + kx for ky in range(3) for kx in range(3))
    p2 = -(-(max(off2) + mq) // 8) * 8

    # 1.0 for valid output columns (col < Wo), 0.0 for the two junk columns of each row.
    mask = (jnp.arange(mq, dtype=jnp.int32) % rowq < wo).astype(jnp.float32).reshape(mq, 1)

    w1 = params["w1"].reshape(9, cin, planes).astype(jnp.bfloat16)
    w2 = params["w2"].reshape(9, planes, planes).astype(jnp.bfloat16)
    s1, b1 = (v.reshape(1, planes).astype(jnp.float32) for v in params["bn1"])
    s2, b2 = (v.reshape(1, planes).astype(jnp.float32) for v in params["bn2"])

    vec_spec = pl.BlockSpec((1, planes), lambda b: (0, 0))
    args = [flat, mask, w1, s1, b1, w2, s2, b2]
    in_specs = [
        pl.BlockSpec((None, p1, cin), lambda b: (b, 0, 0)),          # per-batch flat source
        pl.BlockSpec((mq, 1), lambda b: (0, 0)),                     # column-validity mask
        pl.BlockSpec((9, cin, planes), lambda b: (0, 0, 0)),         # w1 (bf16)
        vec_spec, vec_spec,                                          # bn1 scale/bias
        pl.BlockSpec((9, planes, planes), lambda b: (0, 0, 0)),      # w2 (bf16)
        vec_spec, vec_spec,                                          # bn2 scale/bias
    ]
    if has_down:
        ws = params["ws"].astype(jnp.bfloat16)
        ss, bs = (v.reshape(1, planes).astype(jnp.float32) for v in params["bns"])
        args += [ws, ss, bs]
        in_specs += [pl.BlockSpec((cin, planes), lambda b: (0, 0)), vec_spec, vec_spec]

    kernel = functools.partial(
        _basic_block_kernel, off1=off1, off2=off2, sc_off=sc_off,
        mq=mq, store_off=store_off, has_down=has_down)

    # Right-sized VMEM budget (double-buffered I/O + scratches + bf16 weights), capped for v7x.
    need = (3 * p1 * cin * 4 + p2 * planes * 4 + 3 * mq * planes * 4
            + 4 * (9 * cin * planes + 9 * planes * planes + cin * planes)
            + (8 * planes + mq) * 4)
    vmem_limit = int(min(48 * 2 ** 20, max(8 * 2 ** 20, 2 * need)))

    out = pl.pallas_call(
        kernel,
        out_shape=jax.ShapeDtypeStruct((B, mq, planes), jnp.float32),
        grid=(B,),
        in_specs=in_specs,
        out_specs=pl.BlockSpec((None, mq, planes), lambda b: (b, 0, 0)),
        scratch_shapes=[pltpu.VMEM((p1, cin), jnp.float32),          # relu(x) flat source
                        pltpu.VMEM((p2, planes), jnp.float32)],      # padded conv1 output
        compiler_params=pltpu.CompilerParams(
            dimension_semantics=("parallel",),       # v7x: shard batch across both TensorCores
            vmem_limit_bytes=vmem_limit,
        ),
    )(*args)

    out = out.reshape(B, ho, rowq, planes)[:, :, :wo, :]             # drop junk columns
    return jnp.transpose(out, (0, 3, 1, 2))                          # NHWC -> NCHW


# ---------------------------------------------------------------------------
# Deterministic parameters + pure-JAX reference (for the self-check).
# ---------------------------------------------------------------------------

def _bn_folded(key, c, eps=1e-5):
    k1, k2, k3, k4 = jax.random.split(key, 4)
    gamma = 1.0 + 0.1 * jax.random.normal(k1, (c,), jnp.float32)
    beta = 0.1 * jax.random.normal(k2, (c,), jnp.float32)
    mean = 0.1 * jax.random.normal(k3, (c,), jnp.float32)
    var = 1.0 + 0.1 * jax.random.uniform(k4, (c,), jnp.float32)
    scale = gamma / jnp.sqrt(var + eps)
    bias = beta - mean * scale
    return scale, bias


def init_basic_block_params(key, inplanes, planes, stride):
    ks = jax.random.split(key, 6)
    p = {
        "w1": jax.random.normal(ks[0], (3, 3, inplanes, planes), jnp.float32)
        / jnp.sqrt(9.0 * inplanes),
        "bn1": _bn_folded(ks[1], planes),
        "w2": jax.random.normal(ks[2], (3, 3, planes, planes), jnp.float32)
        / jnp.sqrt(9.0 * planes),
        "bn2": _bn_folded(ks[3], planes),
    }
    if stride != 1 or inplanes != planes:
        p["ws"] = jax.random.normal(ks[4], (inplanes, planes), jnp.float32) / jnp.sqrt(1.0 * inplanes)
        p["bns"] = _bn_folded(ks[5], planes)
    return p


def basic_block_reference(x_nchw, params, stride):
    """Pure-JAX f32 reference of the PyTorch BasicBlock forward."""
    x = jnp.transpose(x_nchw, (0, 2, 3, 1)).astype(jnp.float32)
    y = jnp.maximum(x, 0.0)                                          # x = F.relu(x)

    def conv(inp, w, s, pad):
        return jax.lax.conv_general_dilated(
            inp, w, window_strides=(s, s), padding=pad,
            dimension_numbers=("NHWC", "HWIO", "NHWC"),
            precision=jax.lax.Precision.HIGHEST)

    s1, b1 = params["bn1"]
    s2, b2 = params["bn2"]
    out = conv(y, params["w1"], stride, ((1, 1), (1, 1))) * s1 + b1
    out = jnp.maximum(out, 0.0)
    out = conv(out, params["w2"], 1, ((1, 1), (1, 1))) * s2 + b2
    if "ws" in params:
        ss, bs = params["bns"]
        ident = conv(y, params["ws"][None, None, :, :], stride, ((0, 0), (0, 0))) * ss + bs
    else:
        ident = y
    return jnp.transpose(out + ident, (0, 3, 1, 2))


# ---------------------------------------------------------------------------
# Demo
# ---------------------------------------------------------------------------

if __name__ == "__main__":
    key = jax.random.PRNGKey(0)
    kp1, kp2, kx = jax.random.split(key, 3)

    x = jax.random.normal(kx, (2, 64, 16, 16), jnp.float32)          # NCHW, like PyTorch

    # 1) downsample block: inplanes=64 -> planes=128, stride=2 (1x1-conv + BN shortcut)
    p_down = init_basic_block_params(kp1, 64, 128, stride=2)
    y_down = basic_block_forward(x, p_down, stride=2)
    jax.block_until_ready(y_down)
    assert y_down.shape == (2, 128, 8, 8)

    # 2) identity block: inplanes = planes = 64, stride=1 (identity shortcut)
    p_id = init_basic_block_params(kp2, 64, 64, stride=1)
    y_id = basic_block_forward(x, p_id, stride=1)
    jax.block_until_ready(y_id)
    assert y_id.shape == (2, 64, 16, 16)

    # numerical self-check vs a pure-JAX f32 reference (bf16 MXU => loose tolerance)
    for y, p, s in ((y_down, p_down, 2), (y_id, p_id, 1)):
        ref = basic_block_reference(x, p, s)
        err = jnp.max(jnp.abs(y - ref)) / jnp.maximum(1.0, jnp.max(jnp.abs(ref)))
        assert float(err) < 3e-2, f"mismatch: rel-max-err={float(err):.4f}"

    print("KERNEL_OK")
</pallas_src>

<mosaic_0001>
module attributes {stable_mosaic.version = 11 : i64} {
  func.func @_basic_block_kernel(%arg0: i32, %arg1: memref<1x360x64xf32, #tpu.memory_space<vmem>>, %arg2: memref<80x1xf32, #tpu.memory_space<vmem>>, %arg3: memref<9x64x128xbf16, #tpu.memory_space<vmem>>, %arg4: memref<1x128xf32, #tpu.memory_space<vmem>>, %arg5: memref<1x128xf32, #tpu.memory_space<vmem>>, %arg6: memref<9x128x128xbf16, #tpu.memory_space<vmem>>, %arg7: memref<1x128xf32, #tpu.memory_space<vmem>>, %arg8: memref<1x128xf32, #tpu.memory_space<vmem>>, %arg9: memref<64x128xbf16, #tpu.memory_space<vmem>>, %arg10: memref<1x128xf32, #tpu.memory_space<vmem>>, %arg11: memref<1x128xf32, #tpu.memory_space<vmem>>, %arg12: memref<1x80x128xf32, #tpu.memory_space<vmem>>, %arg13: memref<360x64xf32, #tpu.memory_space<vmem>>, %arg14: memref<112x128xf32, #tpu.memory_space<vmem>>) attributes {dimension_semantics = [#tpu.dimension_semantics<parallel>], iteration_bounds = array<i64: 2>, scalar_prefetch = 0 : i64, scratch_operands = 2 : i64, tpu.core_type = #tpu.core_type<tc>, window_params = [{transform_indices = @transform_0, window_bounds = array<i64: 1, 360, 64>}, {pipeline_mode = #tpu.pipeline_mode<synchronous>, transform_indices = @transform_1, window_bounds = array<i64: 80, 1>}, {pipeline_mode = #tpu.pipeline_mode<synchronous>, transform_indices = @transform_2, window_bounds = array<i64: 9, 64, 128>}, {pipeline_mode = #tpu.pipeline_mode<synchronous>, transform_indices = @transform_3, window_bounds = array<i64: 1, 128>}, {pipeline_mode = #tpu.pipeline_mode<synchronous>, transform_indices = @transform_4, window_bounds = array<i64: 1, 128>}, {pipeline_mode = #tpu.pipeline_mode<synchronous>, transform_indices = @transform_5, window_bounds = array<i64: 9, 128, 128>}, {pipeline_mode = #tpu.pipeline_mode<synchronous>, transform_indices = @transform_6, window_bounds = array<i64: 1, 128>}, {pipeline_mode = #tpu.pipeline_mode<synchronous>, transform_indices = @transform_7, window_bounds = array<i64: 1, 128>}, {pipeline_mode = #tpu.pipeline_mode<synchronous>, transform_indices = @transform_8, window_bounds = array<i64: 64, 128>}, {pipeline_mode = #tpu.pipeline_mode<synchronous>, transform_indices = @transform_9, window_bounds = array<i64: 1, 128>}, {pipeline_mode = #tpu.pipeline_mode<synchronous>, transform_indices = @transform_10, window_bounds = array<i64: 1, 128>}, {transform_indices = @transform_11, window_bounds = array<i64: 1, 80, 128>}]} {
    %c0 = arith.constant 0 : index
    %c0_0 = arith.constant 0 : index
    %c0_1 = arith.constant 0 : index
    %0 = vector.load %arg1[%c0, %c0_0, %c0_1] : memref<1x360x64xf32, #tpu.memory_space<vmem>>, vector<1x360x64xf32>
    %1 = vector.shape_cast %0 : vector<1x360x64xf32> to vector<360x64xf32>
    %cst = arith.constant 0.000000e+00 : f32
    %2 = vector.broadcast %cst : f32 to vector<360x64xf32>
    %3 = arith.maximumf %1, %2 : vector<360x64xf32>
    %c0_2 = arith.constant 0 : index
    %c0_3 = arith.constant 0 : index
    %4 = vector.load %arg13[%c0_2, %c0_3] : memref<360x64xf32, #tpu.memory_space<vmem>>, vector<360x64xf32>
    tpu.vector_store %arg13[%c0_2, %c0_3], %3 {strides = array<i32>} : memref<360x64xf32, #tpu.memory_space<vmem>>, vector<360x64xf32>,
    %cst_4 = arith.constant 0.000000e+00 : f32
    %5 = vector.broadcast %cst_4 : f32 to vector<80x128xf32>
    %c0_5 = arith.constant 0 : index
    %c0_6 = arith.constant 0 : index
    %6 = vector.load %arg13[%c0_5, %c0_6] : memref<360x64xf32, #tpu.memory_space<vmem>>, vector<80x64xf32>
    %7 = arith.truncf %6 : vector<80x64xf32> to vector<80x64xbf16>
    %c0_7 = arith.constant 0 : index
    %c0_8 = arith.constant 0 : index
    %c0_9 = arith.constant 0 : index
    %8 = vector.load %arg3[%c0_7, %c0_8, %c0_9] : memref<9x64x128xbf16, #tpu.memory_space<vmem>>, vector<1x64x128xbf16>
    %9 = vector.shape_cast %8 : vector<1x64x128xbf16> to vector<64x128xbf16>
    %cst_10 = arith.constant dense<0.000000e+00> : vector<80x128xf32>
    %10 = tpu.matmul %7, %9, %cst_10 {dimension_numbers = #tpu.dot_dimension_numbers<[1], [0], [0], [1], [0, 0, 1, 1], [], []>} : vector<80x64xbf16>, vector<64x128xbf16>, vector<80x128xf32> -> vector<80x128xf32>
    %11 = arith.addf %5, %10 : vector<80x128xf32>
    %c90 = arith.constant 90 : index
    %c0_11 = arith.constant 0 : index
    %12 = vector.load %arg13[%c90, %c0_11] : memref<360x64xf32, #tpu.memory_space<vmem>>, vector<80x64xf32>
    %13 = arith.truncf %12 : vector<80x64xf32> to vector<80x64xbf16>
    %c1 = arith.constant 1 : index
    %c0_12 = arith.constant 0 : index
    %c0_13 = arith.constant 0 : index
    %14 = vector.load %arg3[%c1, %c0_12, %c0_13] : memref<9x64x128xbf16, #tpu.memory_space<vmem>>, vector<1x64x128xbf16>
    %15 = vector.shape_cast %14 : vector<1x64x128xbf16> to vector<64x128xbf16>
    %cst_14 = arith.constant dense<0.000000e+00> : vector<80x128xf32>
    %16 = tpu.matmul %13, %15, %cst_14 {dimension_numbers = #tpu.dot_dimension_numbers<[1], [0], [0], [1], [0, 0, 1, 1], [], []>} : vector<80x64xbf16>, vector<64x128xbf16>, vector<80x128xf32> -> vector<80x128xf32>
    %17 = arith.addf %11, %16 : vector<80x128xf32>
    %c1_15 = arith.constant 1 : index
    %c0_16 = arith.constant 0 : index
    %18 = vector.load %arg13[%c1_15, %c0_16] : memref<360x64xf32, #tpu.memory_space<vmem>>, vector<80x64xf32>
    %19 = arith.truncf %18 : vector<80x64xf32> to vector<80x64xbf16>
    %c2 = arith.constant 2 : index
    %c0_17 = arith.constant 0 : index
    %c0_18 = arith.constant 0 : index
    %20 = vector.load %arg3[%c2, %c0_17, %c0_18] : memref<9x64x128xbf16, #tpu.memory_space<vmem>>, vector<1x64x128xbf16>
    %21 = vector.shape_cast %20 : vector<1x64x128xbf16> to vector<64x128xbf16>
    %cst_19 = arith.constant dense<0.000000e+00> : vector<80x128xf32>
    %22 = tpu.matmul %19, %21, %cst_19 {dimension_numbers = #tpu.dot_dimension_numbers<[1], [0], [0], [1], [0, 0, 1, 1], [], []>} : vector<80x64xbf16>, vector<64x128xbf16>, vector<80x128xf32> -> vector<80x128xf32>
    %23 = arith.addf %17, %22 : vector<80x128xf32>
    %c180 = arith.constant 180 : index
    %c0_20 = arith.constant 0 : index
    %24 = vector.load %arg13[%c180, %c0_20] : memref<360x64xf32, #tpu.memory_space<vmem>>, vector<80x64xf32>
    %25 = arith.truncf %24 : vector<80x64xf32> to vector<80x64xbf16>
    %c3 = arith.constant 3 : index
    %c0_21 = arith.constant 0 : index
    %c0_22 = arith.constant 0 : index
    %26 = vector.load %arg3[%c3, %c0_21, %c0_22] : memref<9x64x128xbf16, #tpu.memory_space<vmem>>, vector<1x64x128xbf16>
    %27 = vector.shape_cast %26 : vector<1x64x128xbf16> to vector<64x128xbf16>
    %cst_23 = arith.constant dense<0.000000e+00> : vector<80x128xf32>
    %28 = tpu.matmul %25, %27, %cst_23 {dimension_numbers = #tpu.dot_dimension_numbers<[1], [0], [0], [1], [0, 0, 1, 1], [], []>} : vector<80x64xbf16>, vector<64x128xbf16>, vector<80x128xf32> -> vector<80x128xf32>
    %29 = arith.addf %23, %28 : vector<80x128xf32>
    %c270 = arith.constant 270 : index
    %c0_24 = arith.constant 0 : index
    %30 = vector.load %arg13[%c270, %c0_24] : memref<360x64xf32, #tpu.memory_space<vmem>>, vector<80x64xf32>
    %31 = arith.truncf %30 : vector<80x64xf32> to vector<80x64xbf16>
    %c4 = arith.constant 4 : index
    %c0_25 = arith.constant 0 : index
    %c0_26 = arith.constant 0 : index
    %32 = vector.load %arg3[%c4, %c0_25, %c0_26] : memref<9x64x128xbf16, #tpu.memory_space<vmem>>, vector<1x64x128xbf16>
    %33 = vector.shape_cast %32 : vector<1x64x128xbf16> to vector<64x128xbf16>
    %cst_27 = arith.constant dense<0.000000e+00> : vector<80x128xf32>
    %34 = tpu.matmul %31, %33, %cst_27 {dimension_numbers = #tpu.dot_dimension_numbers<[1], [0], [0], [1], [0, 0, 1, 1], [], []>} : vector<80x64xbf16>, vector<64x128xbf16>, vector<80x128xf32> -> vector<80x128xf32>
    %35 = arith.addf %29, %34 : vector<80x128xf32>
    %c181 = arith.constant 181 : index
    %c0_28 = arith.constant 0 : index
    %36 = vector.load %arg13[%c181, %c0_28] : memref<360x64xf32, #tpu.memory_space<vmem>>, vector<80x64xf32>
    %37 = arith.truncf %36 : vector<80x64xf32> to vector<80x64xbf16>
    %c5 = arith.constant 5 : index
    %c0_29 = arith.constant 0 : index
    %c0_30 = arith.constant 0 : index
    %38 = vector.load %arg3[%c5, %c0_29, %c0_30] : memref<9x64x128xbf16, #tpu.memory_space<vmem>>, vector<1x64x128xbf16>
    %39 = vector.shape_cast %38 : vector<1x64x128xbf16> to vector<64x128xbf16>
    %cst_31 = arith.constant dense<0.000000e+00> : vector<80x128xf32>
    %40 = tpu.matmul %37, %39, %cst_31 {dimension_numbers = #tpu.dot_dimension_numbers<[1], [0], [0], [1], [0, 0, 1, 1], [], []>} : vector<80x64xbf16>, vector<64x128xbf16>, vector<80x128xf32> -> vector<80x128xf32>
    %41 = arith.addf %35, %40 : vector<80x128xf32>
    %c10 = arith.constant 10 : index
    %c0_32 = arith.constant 0 : index
    %42 = vector.load %arg13[%c10, %c0_32] : memref<360x64xf32, #tpu.memory_space<vmem>>, vector<80x64xf32>
    %43 = arith.truncf %42 : vector<80x64xf32> to vector<80x64xbf16>
    %c6 = arith.constant 6 : index
    %c0_33 = arith.constant 0 : index
    %c0_34 = arith.constant 0 : index
    %44 = vector.load %arg3[%c6, %c0_33, %c0_34] : memref<9x64x128xbf16, #tpu.memory_space<vmem>>, vector<1x64x128xbf16>
    %45 = vector.shape_cast %44 : vector<1x64x128xbf16> to vector<64x128xbf16>
    %cst_35 = arith.constant dense<0.000000e+00> : vector<80x128xf32>
    %46 = tpu.matmul %43, %45, %cst_35 {dimension_numbers = #tpu.dot_dimension_numbers<[1], [0], [0], [1], [0, 0, 1, 1], [], []>} : vector<80x64xbf16>, vector<64x128xbf16>, vector<80x128xf32> -> vector<80x128xf32>
    %47 = arith.addf %41, %46 : vector<80x128xf32>
    %c100 = arith.constant 100 : index
    %c0_36 = arith.constant 0 : index
    %48 = vector.load %arg13[%c100, %c0_36] : memref<360x64xf32, #tpu.memory_space<vmem>>, vector<80x64xf32>
    %49 = arith.truncf %48 : vector<80x64xf32> to vector<80x64xbf16>
    %c7 = arith.constant 7 : index
    %c0_37 = arith.constant 0 : index
    %c0_38 = arith.constant 0 : index
    %50 = vector.load %arg3[%c7, %c0_37, %c0_38] : memref<9x64x128xbf16, #tpu.memory_space<vmem>>, vector<1x64x128xbf16>
    %51 = vector.shape_cast %50 : vector<1x64x128xbf16> to vector<64x128xbf16>
    %cst_39 = arith.constant dense<0.000000e+00> : vector<80x128xf32>
    %52 = tpu.matmul %49, %51, %cst_39 {dimension_numbers = #tpu.dot_dimension_numbers<[1], [0], [0], [1], [0, 0, 1, 1], [], []>} : vector<80x64xbf16>, vector<64x128xbf16>, vector<80x128xf32> -> vector<80x128xf32>
    %53 = arith.addf %47, %52 : vector<80x128xf32>
    %c11 = arith.constant 11 : index
    %c0_40 = arith.constant 0 : index
    %54 = vector.load %arg13[%c11, %c0_40] : memref<360x64xf32, #tpu.memory_space<vmem>>, vector<80x64xf32>
    %55 = arith.truncf %54 : vector<80x64xf32> to vector<80x64xbf16>
    %c8 = arith.constant 8 : index
    %c0_41 = arith.constant 0 : index
    %c0_42 = arith.constant 0 : index
    %56 = vector.load %arg3[%c8, %c0_41, %c0_42] : memref<9x64x128xbf16, #tpu.memory_space<vmem>>, vector<1x64x128xbf16>
    %57 = vector.shape_cast %56 : vector<1x64x128xbf16> to vector<64x128xbf16>
    %cst_43 = arith.constant dense<0.000000e+00> : vector<80x128xf32>
    %58 = tpu.matmul %55, %57, %cst_43 {dimension_numbers = #tpu.dot_dimension_numbers<[1], [0], [0], [1], [0, 0, 1, 1], [], []>} : vector<80x64xbf16>, vector<64x128xbf16>, vector<80x128xf32> -> vector<80x128xf32>
    %59 = arith.addf %53, %58 : vector<80x128xf32>
    %c0_44 = arith.constant 0 : index
    %c0_45 = arith.constant 0 : index
    %60 = vector.load %arg4[%c0_44, %c0_45] : memref<1x128xf32, #tpu.memory_space<vmem>>, vector<1x128xf32>
    %61 = vector.broadcast %60 : vector<1x128xf32> to vector<80x128xf32>
    %62 = arith.mulf %59, %61 : vector<80x128xf32>
    %c0_46 = arith.constant 0 : index
    %c0_47 = arith.constant 0 : index
    %63 = vector.load %arg5[%c0_46, %c0_47] : memref<1x128xf32, #tpu.memory_space<vmem>>, vector<1x128xf32>
    %64 = vector.broadcast %63 : vector<1x128xf32> to vector<80x128xf32>
    %65 = arith.addf %62, %64 : vector<80x128xf32>
    %cst_48 = arith.constant 0.000000e+00 : f32
    %66 = vector.broadcast %cst_48 : f32 to vector<80x128xf32>
    %67 = arith.maximumf %65, %66 : vector<80x128xf32>
    %c0_49 = arith.constant 0 : index
    %c0_50 = arith.constant 0 : index
    %68 = vector.load %arg2[%c0_49, %c0_50] : memref<80x1xf32, #tpu.memory_space<vmem>>, vector<80x1xf32>
    %69 = vector.broadcast %68 : vector<80x1xf32> to vector<80x128xf32>
    %70 = arith.mulf %67, %69 : vector<80x128xf32>
    %cst_51 = arith.constant 0.000000e+00 : f32
    %71 = vector.broadcast %cst_51 : f32 to vector<112x128xf32>
    %c0_52 = arith.constant 0 : index
    %c0_53 = arith.constant 0 : index
    %72 = vector.load %arg14[%c0_52, %c0_53] : memref<112x128xf32, #tpu.memory_space<vmem>>, vector<112x128xf32>
    tpu.vector_store %arg14[%c0_52, %c0_53], %71 {strides = array<i32>} : memref<112x128xf32, #tpu.memory_space<vmem>>, vector<112x128xf32>,
    %c16 = arith.constant 16 : index
    %c0_54 = arith.constant 0 : index
    %73 = vector.load %arg14[%c16, %c0_54] : memref<112x128xf32, #tpu.memory_space<vmem>>, vector<80x128xf32>
    tpu.vector_store %arg14[%c16, %c0_54], %70 {strides = array<i32>} : memref<112x128xf32, #tpu.memory_space<vmem>>, vector<80x128xf32>,
    %cst_55 = arith.constant 0.000000e+00 : f32
    %74 = vector.broadcast %cst_55 : f32 to vector<80x128xf32>
    %c5_56 = arith.constant 5 : index
    %c0_57 = arith.constant 0 : index
    %75 = vector.load %arg14[%c5_56, %c0_57] : memref<112x128xf32, #tpu.memory_space<vmem>>, vector<80x128xf32>
    %76 = arith.truncf %75 : vector<80x128xf32> to vector<80x128xbf16>
    %c0_58 = arith.constant 0 : index
    %c0_59 = arith.constant 0 : index
    %c0_60 = arith.constant 0 : index
    %77 = vector.load %arg6[%c0_58, %c0_59, %c0_60] : memref<9x128x128xbf16, #tpu.memory_space<vmem>>, vector<1x128x128xbf16>
    %78 = vector.shape_cast %77 : vector<1x128x128xbf16> to vector<128x128xbf16>
    %cst_61 = arith.constant dense<0.000000e+00> : vector<80x128xf32>
    %79 = tpu.matmul %76, %78, %cst_61 {dimension_numbers = #tpu.dot_dimension_numbers<[1], [0], [0], [1], [0, 0, 1, 1], [], []>} : vector<80x128xbf16>, vector<128x128xbf16>, vector<80x128xf32> -> vector<80x128xf32>
    %80 = arith.addf %74, %79 : vector<80x128xf32>
    %c6_62 = arith.constant 6 : index
    %c0_63 = arith.constant 0 : index
    %81 = vector.load %arg14[%c6_62, %c0_63] : memref<112x128xf32, #tpu.memory_space<vmem>>, vector<80x128xf32>
    %82 = arith.truncf %81 : vector<80x128xf32> to vector<80x128xbf16>
    %c1_64 = arith.constant 1 : index
    %c0_65 = arith.constant 0 : index
    %c0_66 = arith.constant 0 : index
    %83 = vector.load %arg6[%c1_64, %c0_65, %c0_66] : memref<9x128x128xbf16, #tpu.memory_space<vmem>>, vector<1x128x128xbf16>
    %84 = vector.shape_cast %83 : vector<1x128x128xbf16> to vector<128x128xbf16>
    %cst_67 = arith.constant dense<0.000000e+00> : vector<80x128xf32>
    %85 = tpu.matmul %82, %84, %cst_67 {dimension_numbers = #tpu.dot_dimension_numbers<[1], [0], [0], [1], [0, 0, 1, 1], [], []>} : vector<80x128xbf16>, vector<128x128xbf16>, vector<80x128xf32> -> vector<80x128xf32>
    %86 = arith.addf %80, %85 : vector<80x128xf32>
    %c7_68 = arith.constant 7 : index
    %c0_69 = arith.constant 0 : index
    %87 = vector.load %arg14[%c7_68, %c0_69] : memref<112x128xf32, #tpu.memory_space<vmem>>, vector<80x128xf32>
    %88 = arith.truncf %87 : vector<80x128xf32> to vector<80x128xbf16>
    %c2_70 = arith.constant 2 : index
    %c0_71 = arith.constant 0 : index
    %c0_72 = arith.constant 0 : index
    %89 = vector.load %arg6[%c2_70, %c0_71, %c0_72] : memref<9x128x128xbf16, #tpu.memory_space<vmem>>, vector<1x128x128xbf16>
    %90 = vector.shape_cast %89 : vector<1x128x128xbf16> to vector<128x128xbf16>
    %cst_73 = arith.constant dense<0.000000e+00> : vector<80x128xf32>
    %91 = tpu.matmul %88, %90, %cst_73 {dimension_numbers = #tpu.dot_dimension_numbers<[1], [0], [0], [1], [0, 0, 1, 1], [], []>} : vector<80x128xbf16>, vector<128x128xbf16>, vector<80x128xf32> -> vector<80x128xf32>
    %92 = arith.addf %86, %91 : vector<80x128xf32>
    %c15 = arith.constant 15 : index
    %c0_74 = arith.constant 0 : index
    %93 = vector.load %arg14[%c15, %c0_74] : memref<112x128xf32, #tpu.memory_space<vmem>>, vector<80x128xf32>
    %94 = arith.truncf %93 : vector<80x128xf32> to vector<80x128xbf16>
    %c3_75 = arith.constant 3 : index
    %c0_76 = arith.constant 0 : index
    %c0_77 = arith.constant 0 : index
    %95 = vector.load %arg6[%c3_75, %c0_76, %c0_77] : memref<9x128x128xbf16, #tpu.memory_space<vmem>>, vector<1x128x128xbf16>
    %96 = vector.shape_cast %95 : vector<1x128x128xbf16> to vector<128x128xbf16>
    %cst_78 = arith.constant dense<0.000000e+00> : vector<80x128xf32>
    %97 = tpu.matmul %94, %96, %cst_78 {dimension_numbers = #tpu.dot_dimension_numbers<[1], [0], [0], [1], [0, 0, 1, 1], [], []>} : vector<80x128xbf16>, vector<128x128xbf16>, vector<80x128xf32> -> vector<80x128xf32>
    %98 = arith.addf %92, %97 : vector<80x128xf32>
    %c16_79 = arith.constant 16 : index
    %c0_80 = arith.constant 0 : index
    %99 = vector.load %arg14[%c16_79, %c0_80] : memref<112x128xf32, #tpu.memory_space<vmem>>, vector<80x128xf32>
    %100 = arith.truncf %99 : vector<80x128xf32> to vector<80x128xbf16>
    %c4_81 = arith.constant 4 : index
    %c0_82 = arith.constant 0 : index
    %c0_83 = arith.constant 0 : index
    %101 = vector.load %arg6[%c4_81, %c0_82, %c0_83] : memref<9x128x128xbf16, #tpu.memory_space<vmem>>, vector<1x128x128xbf16>
    %102 = vector.shape_cast %101 : vector<1x128x128xbf16> to vector<128x128xbf16>
    %cst_84 = arith.constant dense<0.000000e+00> : vector<80x128xf32>
    %103 = tpu.matmul %100, %102, %cst_84 {dimension_numbers = #tpu.dot_dimension_numbers<[1], [0], [0], [1], [0, 0, 1, 1], [], []>} : vector<80x128xbf16>, vector<128x128xbf16>, vector<80x128xf32> -> vector<80x128xf32>
    %104 = arith.addf %98, %103 : vector<80x128xf32>
    %c17 = arith.constant 17 : index
    %c0_85 = arith.constant 0 : index
    %105 = vector.load %arg14[%c17, %c0_85] : memref<112x128xf32, #tpu.memory_space<vmem>>, vector<80x128xf32>
    %106 = arith.truncf %105 : vector<80x128xf32> to vector<80x128xbf16>
    %c5_86 = arith.constant 5 : index
    %c0_87 = arith.constant 0 : index
    %c0_88 = arith.constant 0 : index
    %107 = vector.load %arg6[%c5_86, %c0_87, %c0_88] : memref<9x128x128xbf16, #tpu.memory_space<vmem>>, vector<1x128x128xbf16>
    %108 = vector.shape_cast %107 : vector<1x128x128xbf16> to vector<128x128xbf16>
    %cst_89 = arith.constant dense<0.000000e+00> : vector<80x128xf32>
    %109 = tpu.matmul %106, %108, %cst_89 {dimension_numbers = #tpu.dot_dimension_numbers<[1], [0], [0], [1], [0, 0, 1, 1], [], []>} : vector<80x128xbf16>, vector<128x128xbf16>, vector<80x128xf32> -> vector<80x128xf32>
    %110 = arith.addf %104, %109 : vector<80x128xf32>
    %c25 = arith.constant 25 : index
    %c0_90 = arith.constant 0 : index
    %111 = vector.load %arg14[%c25, %c0_90] : memref<112x128xf32, #tpu.memory_space<vmem>>, vector<80x128xf32>
    %112 = arith.truncf %111 : vector<80x128xf32> to vector<80x128xbf16>
    %c6_91 = arith.constant 6 : index
    %c0_92 = arith.constant 0 : index
    %c0_93 = arith.constant 0 : index
    %113 = vector.load %arg6[%c6_91, %c0_92, %c0_93] : memref<9x128x128xbf16, #tpu.memory_space<vmem>>, vector<1x128x128xbf16>
    %114 = vector.shape_cast %113 : vector<1x128x128xbf16> to vector<128x128xbf16>
    %cst_94 = arith.constant dense<0.000000e+00> : vector<80x128xf32>
    %115 = tpu.matmul %112, %114, %cst_94 {dimension_numbers = #tpu.dot_dimension_numbers<[1], [0], [0], [1], [0, 0, 1, 1], [], []>} : vector<80x128xbf16>, vector<128x128xbf16>, vector<80x128xf32> -> vector<80x128xf32>
    %116 = arith.addf %110, %115 : vector<80x128xf32>
    %c26 = arith.constant 26 : index
    %c0_95 = arith.constant 0 : index
    %117 = vector.load %arg14[%c26, %c0_95] : memref<112x128xf32, #tpu.memory_space<vmem>>, vector<80x128xf32>
    %118 = arith.truncf %117 : vector<80x128xf32> to vector<80x128xbf16>
    %c7_96 = arith.constant 7 : index
    %c0_97 = arith.constant 0 : index
    %c0_98 = arith.constant 0 : index
    %119 = vector.load %arg6[%c7_96, %c0_97, %c0_98] : memref<9x128x128xbf16, #tpu.memory_space<vmem>>, vector<1x128x128xbf16>
    %120 = vector.shape_cast %119 : vector<1x128x128xbf16> to vector<128x128xbf16>
    %cst_99 = arith.constant dense<0.000000e+00> : vector<80x128xf32>
    %121 = tpu.matmul %118, %120, %cst_99 {dimension_numbers = #tpu.dot_dimension_numbers<[1], [0], [0], [1], [0, 0, 1, 1], [], []>} : vector<80x128xbf16>, vector<128x128xbf16>, vector<80x128xf32> -> vector<80x128xf32>
    %122 = arith.addf %116, %121 : vector<80x128xf32>
    %c27 = arith.constant 27 : index
    %c0_100 = arith.constant 0 : index
    %123 = vector.load %arg14[%c27, %c0_100] : memref<112x128xf32, #tpu.memory_space<vmem>>, vector<80x128xf32>
    %124 = arith.truncf %123 : vector<80x128xf32> to vector<80x128xbf16>
    %c8_101 = arith.constant 8 : index
    %c0_102 = arith.constant 0 : index
    %c0_103 = arith.constant 0 : index
    %125 = vector.load %arg6[%c8_101, %c0_102, %c0_103] : memref<9x128x128xbf16, #tpu.memory_space<vmem>>, vector<1x128x128xbf16>
    %126 = vector.shape_cast %125 : vector<1x128x128xbf16> to vector<128x128xbf16>
    %cst_104 = arith.constant dense<0.000000e+00> : vector<80x128xf32>
    %127 = tpu.matmul %124, %126, %cst_104 {dimension_numbers = #tpu.dot_dimension_numbers<[1], [0], [0], [1], [0, 0, 1, 1], [], []>} : vector<80x128xbf16>, vector<128x128xbf16>, vector<80x128xf32> -> vector<80x128xf32>
    %128 = arith.addf %122, %127 : vector<80x128xf32>
    %c0_105 = arith.constant 0 : index
    %c0_106 = arith.constant 0 : index
    %129 = vector.load %arg7[%c0_105, %c0_106] : memref<1x128xf32, #tpu.memory_space<vmem>>, vector<1x128xf32>
    %130 = vector.broadcast %129 : vector<1x128xf32> to vector<80x128xf32>
    %131 = arith.mulf %128, %130 : vector<80x128xf32>
    %c0_107 = arith.constant 0 : index
    %c0_108 = arith.constant 0 : index
    %132 = vector.load %arg8[%c0_107, %c0_108] : memref<1x128xf32, #tpu.memory_space<vmem>>, vector<1x128xf32>
    %133 = vector.broadcast %132 : vector<1x128xf32> to vector<80x128xf32>
    %134 = arith.addf %131, %133 : vector<80x128xf32>
    %c270_109 = arith.constant 270 : index
    %c0_110 = arith.constant 0 : index
    %135 = vector.load %arg13[%c270_109, %c0_110] : memref<360x64xf32, #tpu.memory_space<vmem>>, vector<80x64xf32>
    %136 = arith.truncf %135 : vector<80x64xf32> to vector<80x64xbf16>
    %c0_111 = arith.constant 0 : index
    %c0_112 = arith.constant 0 : index
    %137 = vector.load %arg9[%c0_111, %c0_112] : memref<64x128xbf16, #tpu.memory_space<vmem>>, vector<64x128xbf16>
    %cst_113 = arith.constant dense<0.000000e+00> : vector<80x128xf32>
    %138 = tpu.matmul %136, %137, %cst_113 {dimension_numbers = #tpu.dot_dimension_numbers<[1], [0], [0], [1], [0, 0, 1, 1], [], []>} : vector<80x64xbf16>, vector<64x128xbf16>, vector<80x128xf32> -> vector<80x128xf32>
    %c0_114 = arith.constant 0 : index
    %c0_115 = arith.constant 0 : index
    %139 = vector.load %arg10[%c0_114, %c0_115] : memref<1x128xf32, #tpu.memory_space<vmem>>, vector<1x128xf32>
    %140 = vector.broadcast %139 : vector<1x128xf32> to vector<80x128xf32>
    %141 = arith.mulf %138, %140 : vector<80x128xf32>
    %c0_116 = arith.constant 0 : index
    %c0_117 = arith.constant 0 : index
    %142 = vector.load %arg11[%c0_116, %c0_117] : memref<1x128xf32, #tpu.memory_space<vmem>>, vector<1x128xf32>
    %143 = vector.broadcast %142 : vector<1x128xf32> to vector<80x128xf32>
    %144 = arith.addf %141, %143 : vector<80x128xf32>
    %145 = arith.addf %134, %144 : vector<80x128xf32>
    %c0_118 = arith.constant 0 : index
    %c0_119 = arith.constant 0 : index
    %c0_120 = arith.constant 0 : index
    %146 = vector.load %arg12[%c0_118, %c0_119, %c0_120] : memref<1x80x128xf32, #tpu.memory_space<vmem>>, vector<1x80x128xf32>
    %147 = vector.shape_cast %146 : vector<1x80x128xf32> to vector<80x128xf32>
    %148 = vector.shape_cast %145 : vector<80x128xf32> to vector<1x80x128xf32>
    tpu.vector_store %arg12[%c0_118, %c0_119, %c0_120], %148 {strides = array<i32>} : memref<1x80x128xf32, #tpu.memory_space<vmem>>, vector<1x80x128xf32>,
    return
  }
  func.func @transform_0(%arg0: i32) -> (i32, i32, i32) {
    %c0_i32 = arith.constant 0 : i32
    %c0_i32_0 = arith.constant 0 : i32
    %c0_i32_1 = arith.constant 0 : i32
    return %arg0, %c0_i32, %c0_i32_0 : i32, i32, i32
  }
  func.func @transform_1(%arg0: i32) -> (i32, i32) {
    %c0_i32 = arith.constant 0 : i32
    %c0_i32_0 = arith.constant 0 : i32
    %c0_i32_1 = arith.constant 0 : i32
    return %c0_i32, %c0_i32_0 : i32, i32
  }
  func.func @transform_2(%arg0: i32) -> (i32, i32, i32) {
    %c0_i32 = arith.constant 0 : i32
    %c0_i32_0 = arith.constant 0 : i32
    %c0_i32_1 = arith.constant 0 : i32
    %c0_i32_2 = arith.constant 0 : i32
    return %c0_i32, %c0_i32_0, %c0_i32_1 : i32, i32, i32
  }
  func.func @transform_3(%arg0: i32) -> (i32, i32) {
    %c0_i32 = arith.constant 0 : i32
    %c0_i32_0 = arith.constant 0 : i32
    %c0_i32_1 = arith.constant 0 : i32
    return %c0_i32, %c0_i32_0 : i32, i32
  }
  func.func @transform_4(%arg0: i32) -> (i32, i32) {
    %c0_i32 = arith.constant 0 : i32
    %c0_i32_0 = arith.constant 0 : i32
    %c0_i32_1 = arith.constant 0 : i32
    return %c0_i32, %c0_i32_0 : i32, i32
  }
  func.func @transform_5(%arg0: i32) -> (i32, i32, i32) {
    %c0_i32 = arith.constant 0 : i32
    %c0_i32_0 = arith.constant 0 : i32
    %c0_i32_1 = arith.constant 0 : i32
    %c0_i32_2 = arith.constant 0 : i32
    return %c0_i32, %c0_i32_0, %c0_i32_1 : i32, i32, i32
  }
  func.func @transform_6(%arg0: i32) -> (i32, i32) {
    %c0_i32 = arith.constant 0 : i32
    %c0_i32_0 = arith.constant 0 : i32
    %c0_i32_1 = arith.constant 0 : i32
    return %c0_i32, %c0_i32_0 : i32, i32
  }
  func.func @transform_7(%arg0: i32) -> (i32, i32) {
    %c0_i32 = arith.constant 0 : i32
    %c0_i32_0 = arith.constant 0 : i32
    %c0_i32_1 = arith.constant 0 : i32
    return %c0_i32, %c0_i32_0 : i32, i32
  }
  func.func @transform_8(%arg0: i32) -> (i32, i32) {
    %c0_i32 = arith.constant 0 : i32
    %c0_i32_0 = arith.constant 0 : i32
    %c0_i32_1 = arith.constant 0 : i32
    return %c0_i32, %c0_i32_0 : i32, i32
  }
  func.func @transform_9(%arg0: i32) -> (i32, i32) {
    %c0_i32 = arith.constant 0 : i32
    %c0_i32_0 = arith.constant 0 : i32
    %c0_i32_1 = arith.constant 0 : i32
    return %c0_i32, %c0_i32_0 : i32, i32
  }
  func.func @transform_10(%arg0: i32) -> (i32, i32) {
    %c0_i32 = arith.constant 0 : i32
    %c0_i32_0 = arith.constant 0 : i32
    %c0_i32_1 = arith.constant 0 : i32
    return %c0_i32, %c0_i32_0 : i32, i32
  }
  func.func @transform_11(%arg0: i32) -> (i32, i32, i32) {
    %c0_i32 = arith.constant 0 : i32
    %c0_i32_0 = arith.constant 0 : i32
    %c0_i32_1 = arith.constant 0 : i32
    return %arg0, %c0_i32, %c0_i32_0 : i32, i32, i32
  }
}

</mosaic_0001>

<bundles_post_ra>
// kernel: basic_block_forward.1
= control target key start
LH: loop header
LB: loop body
LE: loop exit
PB: predicated region body
PF: predicated region fallthrough
CT: control target
= control target key end

     0   :  { %s5381_s17 = smov 0   ;;  %s6404_s0 = inlined_call_operand.vmem [shape: f32[2,360,64], index: 0, kind: input, shape index: {}]   ;;  %s6405_s1 = inlined_call_operand.vmem [shape: f32[80,1], index: 1, kind: input, shape index: {}]   ;;  %s6406_s2 = inlined_call_operand.vmem [shape: bf16[9,64,128], index: 2, kind: input, shape index: {}]   ;;  %s6407_s3 = inlined_call_operand.vmem [shape: f32[1,128], index: 3, kind: input, shape index: {}]   ;;  %s6408_s4 = inlined_call_operand.vmem [shape: f32[1,128], index: 4, kind: input, shape index: {}]   ;;  %s6409_s5 = inlined_call_operand.vmem [shape: bf16[9,128,128], index: 5, kind: input, shape index: {}]   ;;  %s6410_s6 = inlined_call_operand.vmem [shape: f32[1,128], index: 6, kind: input, shape index: {}]   ;;  %s6411_s7 = inlined_call_operand.vmem [shape: f32[1,128], index: 7, kind: input, shape index: {}]   ;;  %s6412_s8 = inlined_call_operand.vmem [shape: bf16[64,128], index: 8, kind: input, shape index: {}]   ;;  %s6413_s9 = inlined_call_operand.vmem [shape: f32[1,128], index: 9, kind: input, shape index: {}]   ;;  %s6414_s10 = inlined_call_operand.vmem [shape: f32[1,128], index: 10, kind: input, shape index: {}]   ;;  %s6415_s11 = inlined_call_operand.vmem [shape: f32[2,80,128], index: 11, kind: output, shape index: {}]  }
   0x1 LB: > { %s3679_s18 = sadd.s32 4294967295, %s5316_s17   ;;  %p3683_p0 = scmp.ge.s32.totalorder %s5316_s17, 1  ;;  %s5316_s17 = sphi %s5381_s17, %s21_s17  }
   0x2   : > { %p337_p1 = scmp.lt.s32.totalorder %s5316_s17, 3 }
   0x4   : > { %p338_p2 = pnand %p3683_p0, %p337_p1 }
   0x5   : > { %v5196_v0 = vld [vmem:[%s6406_s2 + $0x20] sm:$0xff] (!%p338_p2)   ;;  %v5318_v1 = vmov (!%p338_p2), 0.0   ;;  %v5197_v2 = vld [vmem:[%s6406_s2 + $0x28] sm:$0xff] (!%p338_p2)   ;;  %vm5319_vm0 = vmmov (!%p338_p2), 0   ;;  %p377_p3 = scmp.lt.s32.totalorder (!%p338_p2), %s3679_s18, 1  ;;  %v5198_v3 = vld [vmem:[%s6406_s2 + $0x30] sm:$0xff] (!%p338_p2)  }
   0x6   : > { %341 = sbr.rel (%p338_p2) target bundleno = 1132 (0x46c), region = 64  ;;  %4255 = vmatprep.subr.bf16.mxu0 (!%p338_p2), %v5318_v1  ;;  %1931 = vst [vmem:[#allocation3] sm:$0xff] (!%p338_p2), %v5318_v1  ;;  %1932 = vst [vmem:[#allocation3 + $0x8] sm:$0xff] (!%p338_p2), %v5318_v1  ;;  %4859 = vmatprep.subr.bf16.mxu1 (!%p338_p2), %v5318_v1  ;;  %v5199_v4 = vld [vmem:[%s6406_s2 + $0x38] sm:$0xff] (!%p338_p2)   ;;  %vm478_vm1 = vcmask (!%p338_p2), 523264   ;;  %v5200_v37 = vld [vmem:[%s6406_s2] sm:$0xff] (!%p338_p2)  }
   0x7   : > { %1943 = vst [vmem:[#allocation3 + $0x60] sm:$0xff] (!%p338_p2), %v5318_v1  ;;  %1944 = vst [vmem:[#allocation3 + $0x68] sm:$0xff] (!%p338_p2), %v5318_v1  ;;  %4256 = vmatpush3.bf16.msra.mxu0 (!%p338_p2), %v5196_v0  ;;  %4263 = vmatprep.mubr.msk.bf16.mxu0 (!%p338_p2), %vm5319_vm0, %v5318_v1  ;;  %v5201_v39 = vld [vmem:[%s6406_s2 + $0x8] sm:$0xff] (!%p338_p2)   ;;  %v5202_v43 = vld [vmem:[%s6406_s2 + $0x10] sm:$0xff] (!%p338_p2)  }
   0x8   : > { %4257 = vmatprep.subr.bf16.mxu0 (!%p338_p2), %v5318_v1  ;;  %4863 = vmatpush3.bf16.msra.mxu1 (!%p338_p2), %v5196_v0  ;;  %v5203_v44 = vld [vmem:[%s6406_s2 + $0x18] sm:$0xff] (!%p338_p2)   ;;  %v5204_v60 = vld [vmem:[%s6406_s2 + $0x40] sm:$0xff] (!%p338_p2)  }
   0x9   : > { %4860 = vmatprep.subr.bf16.mxu1 (!%p338_p2), %v5318_v1  ;;  %4271 = vmatprep.mubr.msk.bf16.mxu1 (!%p338_p2), %vm5319_vm0, %v5318_v1 }
   0xb   : > { %4258 = vmatpush3.bf16.msra.mxu0 (!%p338_p2), %v5197_v2 }
   0xc   : > { %4259 = vmatprep.subr.bf16.mxu0 (!%p338_p2), %v5318_v1  ;;  %4864 = vmatpush3.bf16.msra.mxu1 (!%p338_p2), %v5197_v2 }
   0xd   : > { %s6417_s18 = smov (!%p377_p3, %s3679_s18), 1  ;;  %4861 = vmatprep.subr.bf16.mxu1 %v5318_v1 }
   0xe   : > { %s5181_s25 = smul.u32 360, %s6417_s18 }
   0xf   : > { %4260 = vmatpush3.bf16.msra.mxu0 %v5198_v3  ;;  %s5182_s23 = smul.u32 80, %s6417_s18 }
  0x10   : > { %s5420_s30 = scalar_lea.vmem %s6404_s0, %s5181_s25  ;;  %4261 = vmatprep.subr.bf16.mxu0 %v5318_v1  ;;  %4865 = vmatpush3.bf16.msra.mxu1 %v5198_v3 }
  0x11   : > { %v399_v5 = vld [vmem:[%s5420_s30 + $0x58] sm:$0xff]  ;;  %v400_v6 = vld [vmem:[%s5420_s30 + $0x60] sm:$0xff]  ;;  %v401_v7 = vld [vmem:[%s5420_s30 + $0x68] sm:$0xff]  ;;  %4862 = vmatprep.subr.bf16.mxu1 %v5318_v1  ;;  %s6352_s27 = scalar_lea.vmem %s6415_s11, %s5182_s23 }
  0x12   : > { %v444_v8 = vmax.f32 %v399_v5, 0.0  ;;  %v445_v9 = vmax.f32 %v400_v6, 0.0  ;;  %v446_v10 = vmax.f32 %v401_v7, 0.0  ;;  %v402_v11 = vld [vmem:[%s5420_s30 + $0x70] sm:$0xff]  ;;  %v403_v12 = vld [vmem:[%s5420_s30 + $0x78] sm:$0xff]  ;;  %v388_v15 = vld [vmem:[%s5420_s30] sm:$0xff] }
  0x13   : > { %v447_v13 = vmax.f32 %v402_v11, 0.0  ;;  %v448_v14 = vmax.f32 %v403_v12, 0.0  ;;  %v389_v16 = vld [vmem:[%s5420_s30 + $0x8] sm:$0xff]  ;;  %v390_v17 = vld [vmem:[%s5420_s30 + $0x10] sm:$0xff]  ;;  %v433_v18 = vmax.f32 %v388_v15, 0.0  ;;  %v391_v20 = vld [vmem:[%s5420_s30 + $0x18] sm:$0xff]  ;;  %4262 = vmatpush3.bf16.msra.mxu0 %v5199_v4 }
  0x14   : > { %490 = vst.msk [vmem:[#allocation2 + $0x58] sm:$0xff] %vm478_vm1, %v444_v8  ;;  %491 = vst.msk [vmem:[#allocation2 + $0x60] sm:$0xff] %vm478_vm1, %v445_v9  ;;  %v434_v19 = vmax.f32 %v389_v16, 0.0  ;;  %v435_v21 = vmax.f32 %v390_v17, 0.0  ;;  %v436_v22 = vmax.f32 %v391_v20, 0.0  ;;  %v392_v23 = vld [vmem:[%s5420_s30 + $0x20] sm:$0xff]  ;;  %4283 = vmatprep.subr.bf16.mxu0 %v5318_v1  ;;  %4866 = vmatpush3.bf16.msra.mxu1 %v5199_v4 }
  0x15   : > { %492 = vst.msk [vmem:[#allocation2 + $0x68] sm:$0xff] %vm478_vm1, %v446_v10  ;;  %493 = vst.msk [vmem:[#allocation2 + $0x70] sm:$0xff] %vm478_vm1, %v447_v13  ;;  %v393_v24 = vld [vmem:[%s5420_s30 + $0x28] sm:$0xff]  ;;  %v437_v25 = vmax.f32 %v392_v23, 0.0  ;;  %v394_v27 = vld [vmem:[%s5420_s30 + $0x30] sm:$0xff]  ;;  %4507 = vmatprep.subr.bf16.mxu1 %v5318_v1 }
  0x16   : > { %494 = vst.msk [vmem:[#allocation2 + $0x78] sm:$0xff] %vm478_vm1, %v448_v14  ;;  %479 = vst.msk [vmem:[#allocation2] sm:$0xff] %vm478_vm1, %v433_v18  ;;  %v438_v26 = vmax.f32 %v393_v24, 0.0  ;;  %v395_v28 = vld [vmem:[%s5420_s30 + $0x38] sm:$0xff]  ;;  %v439_v29 = vmax.f32 %v394_v27, 0.0  ;;  %v396_v31 = vld [vmem:[%s5420_s30 + $0x40] sm:$0xff] }
  0x17   : > { %480 = vst.msk [vmem:[#allocation2 + $0x8] sm:$0xff] %vm478_vm1, %v434_v19  ;;  %481 = vst.msk [vmem:[#allocation2 + $0x10] sm:$0xff] %vm478_vm1, %v435_v21  ;;  %v440_v30 = vmax.f32 %v395_v28, 0.0  ;;  %v397_v32 = vld [vmem:[%s5420_s30 + $0x48] sm:$0xff]  ;;  %v441_v33 = vmax.f32 %v396_v31, 0.0  ;;  %v398_v45 = vld [vmem:[%s5420_s30 + $0x50] sm:$0xff] }
  0x18   : > { %482 = vst.msk [vmem:[#allocation2 + $0x18] sm:$0xff] %vm478_vm1, %v436_v22  ;;  %483 = vst.msk [vmem:[#allocation2 + $0x20] sm:$0xff] %vm478_vm1, %v437_v25  ;;  %v442_v34 = vmax.f32 %v397_v32, 0.0  ;;  %v443_v47 = vmax.f32 %v398_v45, 0.0  ;;  %v410_v48 = vld [vmem:[%s5420_s30 + $0xb0] sm:$0xff]  ;;  %v411_v49 = vld [vmem:[%s5420_s30 + $0xb8] sm:$0xff] }
  0x19   : > { %484 = vst.msk [vmem:[#allocation2 + $0x28] sm:$0xff] %vm478_vm1, %v438_v26  ;;  %485 = vst.msk [vmem:[#allocation2 + $0x30] sm:$0xff] %vm478_vm1, %v439_v29  ;;  %v412_v51 = vld [vmem:[%s5420_s30 + $0xc0] sm:$0xff]  ;;  %v455_v52 = vmax.f32 %v410_v48, 0.0  ;;  %v456_v53 = vmax.f32 %v411_v49, 0.0  ;;  %v413_v55 = vld [vmem:[%s5420_s30 + $0xc8] sm:$0xff] }
  0x1a   : > { %486 = vst.msk [vmem:[#allocation2 + $0x38] sm:$0xff] %vm478_vm1, %v440_v30  ;;  %487 = vst.msk [vmem:[#allocation2 + $0x40] sm:$0xff] %vm478_vm1, %v441_v33  ;;  %v457_v54 = vmax.f32 %v412_v51, 0.0  ;;  %v414_v56 = vld [vmem:[%s5420_s30 + $0xd0] sm:$0xff]  ;;  %v458_v57 = vmax.f32 %v413_v55, 0.0  ;;  %v415_v61 = vld [vmem:[%s5420_s30 + $0xd8] sm:$0xff] }
  0x1b   : > { %v547_v35 = vld [vmem:[#allocation2 + $0x5a] sm:$0xff]  ;;  %488 = vst.msk [vmem:[#allocation2 + $0x48] sm:$0xff] %vm478_vm1, %v442_v34  ;;  %489 = vst.msk [vmem:[#allocation2 + $0x50] sm:$0xff] %vm478_vm1, %v443_v47  ;;  %v459_v58 = vmax.f32 %v414_v56, 0.0  ;;  %v460_v63 = vmax.f32 %v415_v61, 0.0  ;;  %v417_v2 = vld [vmem:[%s5420_s30 + $0xe8] sm:$0xff] }
  0x1c   : > { %v548_v36 = vld [vmem:[#allocation2 + $0x62] sm:$0xff]  ;;  %v549_v40 = vld [vmem:[#allocation2 + $0x6a] sm:$0xff]  ;;  %501 = vst.msk [vmem:[#allocation2 + $0xb0] sm:$0xff] %vm478_vm1, %v455_v52  ;;  %502 = vst.msk [vmem:[#allocation2 + $0xb8] sm:$0xff] %vm478_vm1, %v456_v53  ;;  %v462_v5 = vmax.f32 %v417_v2, 0.0 }
  0x1d   : > { %v557_v38 = vpack.c.bf16 %v548_v36, %v547_v35  ;;  %v550_v41 = vld [vmem:[#allocation2 + $0x72] sm:$0xff]  ;;  %v524_v46 = vld [vmem:[#allocation2] sm:$0xff]  ;;  %503 = vst.msk [vmem:[#allocation2 + $0xc0] sm:$0xff] %vm478_vm1, %v457_v54  ;;  %504 = vst.msk [vmem:[#allocation2 + $0xc8] sm:$0xff] %vm478_vm1, %v458_v57 }
  0x1e   : > { %v558_v42 = vpack.c.bf16 %v550_v41, %v549_v40  ;;  %v525_v50 = vld [vmem:[#allocation2 + $0x8] sm:$0xff]  ;;  %v416_v62 = vld [vmem:[%s5420_s30 + $0xe0] sm:$0xff]  ;;  %505 = vst.msk [vmem:[#allocation2 + $0xd0] sm:$0xff] %vm478_vm1, %v459_v58  ;;  %v418_v3 = vld [vmem:[%s5420_s30 + $0xf0] sm:$0xff] }
  0x1f   : > { %4264 = vmatmul.mubr.msk.bf16.vlgmr.msra.gmra.mrb[0].mxu0 %vm478_vm1, %v557_v38  ;;  %v534_v59 = vpack.c.bf16 %v525_v50, %v524_v46  ;;  %v461_v0 = vmax.f32 %v416_v62, 0.0  ;;  %v5205_v4 = vld [vmem:[%s6406_s2 + $0x48] sm:$0xff]   ;;  %506 = vst.msk [vmem:[#allocation2 + $0xd8] sm:$0xff] %vm478_vm1, %v460_v63  ;;  %v463_v6 = vmax.f32 %v418_v3, 0.0  ;;  %v526_v7 = vld [vmem:[#allocation2 + $0x10] sm:$0xff]  ;;  %v419_v8 = vld [vmem:[%s5420_s30 + $0xf8] sm:$0xff] }
  0x20   : > { %4284 = vmatpush3.bf16.msra.mxu0 %v5200_v37  ;;  %4267 = vmatprep.mubr.msk.bf16.mxu0 %vm5319_vm0, %v5318_v1  ;;  %v420_v9 = vld [vmem:[%s5420_s30 + $0x100] sm:$0xff]  ;;  %v527_v10 = vld [vmem:[#allocation2 + $0x18] sm:$0xff]  ;;  %508 = vst.msk [vmem:[#allocation2 + $0xe8] sm:$0xff] %vm478_vm1, %v462_v5  ;;  %v464_v11 = vmax.f32 %v419_v8, 0.0  ;;  %v421_v13 = vld [vmem:[%s5420_s30 + $0x108] sm:$0xff] }
  0x21   : > { %4285 = vmatprep.subr.bf16.mxu0 %v5318_v1  ;;  %507 = vst.msk [vmem:[#allocation2 + $0xe0] sm:$0xff] %vm478_vm1, %v461_v0  ;;  %509 = vst.msk [vmem:[#allocation2 + $0xf0] sm:$0xff] %vm478_vm1, %v463_v6  ;;  %v465_v12 = vmax.f32 %v420_v9, 0.0  ;;  %v422_v14 = vld [vmem:[%s5420_s30 + $0x110] sm:$0xff]  ;;  %v423_v15 = vld [vmem:[%s5420_s30 + $0x118] sm:$0xff]  ;;  %v466_v16 = vmax.f32 %v421_v13, 0.0  ;;  %v535_v19 = vpack.c.bf16 %v527_v10, %v526_v7 }
  0x22   : > { %v467_v17 = vmax.f32 %v422_v14, 0.0  ;;  %510 = vst.msk [vmem:[#allocation2 + $0xf8] sm:$0xff] %vm478_vm1, %v464_v11  ;;  %v468_v18 = vmax.f32 %v423_v15, 0.0  ;;  %v5206_v20 = vld [vmem:[%s6406_s2 + $0x50] sm:$0xff]   ;;  %v424_v21 = vld [vmem:[%s5420_s30 + $0x120] sm:$0xff]  ;;  %v425_v22 = vld [vmem:[%s5420_s30 + $0x128] sm:$0xff] }
  0x23   : > { %511 = vst.msk [vmem:[#allocation2 + $0x100] sm:$0xff] %vm478_vm1, %v465_v12  ;;  %512 = vst.msk [vmem:[#allocation2 + $0x108] sm:$0xff] %vm478_vm1, %v466_v16  ;;  %v469_v23 = vmax.f32 %v424_v21, 0.0  ;;  %v470_v24 = vmax.f32 %v425_v22, 0.0  ;;  %v426_v25 = vld [vmem:[%s5420_s30 + $0x130] sm:$0xff]  ;;  %v427_v26 = vld [vmem:[%s5420_s30 + $0x138] sm:$0xff] }
  0x24   : > { %4286 = vmatpush3.bf16.msra.mxu0 %v5201_v39  ;;  %513 = vst.msk [vmem:[#allocation2 + $0x110] sm:$0xff] %vm478_vm1, %v467_v17  ;;  %514 = vst.msk [vmem:[#allocation2 + $0x118] sm:$0xff] %vm478_vm1, %v468_v18  ;;  %v528_v27 = vld [vmem:[#allocation2 + $0x20] sm:$0xff]  ;;  %v5207_v28 = vld [vmem:[%s6406_s2 + $0x58] sm:$0xff]   ;;  %v471_v29 = vmax.f32 %v426_v25, 0.0  ;;  %v472_v30 = vmax.f32 %v427_v26, 0.0 }
  0x25   : > { %4287 = vmatprep.subr.bf16.mxu0 %v5318_v1  ;;  %515 = vst.msk [vmem:[#allocation2 + $0x120] sm:$0xff] %vm478_vm1, %v469_v23  ;;  %516 = vst.msk [vmem:[#allocation2 + $0x128] sm:$0xff] %vm478_vm1, %v470_v24  ;;  %v529_v31 = vld [vmem:[#allocation2 + $0x28] sm:$0xff]  ;;  %v428_v32 = vld [vmem:[%s5420_s30 + $0x140] sm:$0xff] }
  0x26   : > { %v429_v33 = vld [vmem:[%s5420_s30 + $0x148] sm:$0xff]  ;;  %517 = vst.msk [vmem:[#allocation2 + $0x130] sm:$0xff] %vm478_vm1, %v471_v29  ;;  %518 = vst.msk [vmem:[#allocation2 + $0x138] sm:$0xff] %vm478_vm1, %v472_v30  ;;  %v473_v34 = vmax.f32 %v428_v32, 0.0  ;;  %v430_v36 = vld [vmem:[%s5420_s30 + $0x150] sm:$0xff]  ;;  %v536_v37 = vpack.c.bf16 %v529_v31, %v528_v27 }
  0x27   : > { %4268 = vmatmul.mubr.msk.bf16.gmra.mrb[4].mxu0 %vm478_vm1, %v558_v42  ;;  %v474_v35 = vmax.f32 %v429_v33, 0.0  ;;  %v431_v38 = vld [vmem:[%s5420_s30 + $0x158] sm:$0xff]  ;;  %v475_v39 = vmax.f32 %v430_v36, 0.0  ;;  %v530_v41 = vld [vmem:[#allocation2 + $0x30] sm:$0xff]  ;;  %v533_v45 = vld [vmem:[#allocation2 + $0x48] sm:$0xff] }
  0x28   : > { %4288 = vmatpush3.bf16.msra.mxu0 %v5202_v43  ;;  %4291 = vmatprep.mubr.msk.bf16.mxu0 %vm5319_vm0, %v5318_v1  ;;  %519 = vst.msk [vmem:[#allocation2 + $0x140] sm:$0xff] %vm478_vm1, %v473_v34  ;;  %v476_v40 = vmax.f32 %v431_v38, 0.0  ;;  %v531_v42 = vld [vmem:[#allocation2 + $0x38] sm:$0xff]  ;;  %v795_v47 = vld [vmem:[#allocation2 + $0x1] sm:$0xff]  ;;  %v796_v48 = vld [vmem:[#allocation2 + $0x9] sm:$0xff] }
  0x29   : > { %4289 = vmatprep.subr.bf16.mxu0 %v5318_v1  ;;  %520 = vst.msk [vmem:[#allocation2 + $0x148] sm:$0xff] %vm478_vm1, %v474_v35  ;;  %521 = vst.msk [vmem:[#allocation2 + $0x150] sm:$0xff] %vm478_vm1, %v475_v39  ;;  %v537_v43 = vpack.c.bf16 %v531_v42, %v530_v41  ;;  %v5208_v49 = vld [vmem:[%s6406_s2 + $0x60] sm:$0xff]   ;;  %v805_v50 = vpack.c.bf16 %v796_v48, %v795_v47  ;;  %v797_v51 = vld [vmem:[#allocation2 + $0x11] sm:$0xff] }
  0x2a   : > { %522 = vst.msk [vmem:[#allocation2 + $0x158] sm:$0xff] %vm478_vm1, %v476_v40  ;;  %v798_v52 = vld [vmem:[#allocation2 + $0x19] sm:$0xff]  ;;  %v5209_v53 = vld [vmem:[%s6406_s2 + $0x68] sm:$0xff]   ;;  %v5210_v54 = vld [vmem:[%s6406_s2 + $0x70] sm:$0xff]  }
  0x2b   : > { %v806_v55 = vpack.c.bf16 %v798_v52, %v797_v51  ;;  %v799_v56 = vld [vmem:[#allocation2 + $0x21] sm:$0xff]  ;;  %v800_v57 = vld [vmem:[#allocation2 + $0x29] sm:$0xff]  ;;  %v5211_v58 = vld [vmem:[%s6406_s2 + $0x78] sm:$0xff]  }
  0x2c   : > { %4290 = vmatpush3.bf16.msra.mxu0 %v5203_v44  ;;  %v532_v44 = vld [vmem:[#allocation2 + $0x40] sm:$0xff]  ;;  %v804_v0 = vld [vmem:[#allocation2 + $0x49] sm:$0xff]  ;;  %v941_v3 = vld [vmem:[#allocation2 + $0xb4] sm:$0xff] }
  0x2d   : > { %4311 = vmatprep.subr.bf16.mxu0 %v5318_v1  ;;  %v538_v46 = vpack.c.bf16 %v533_v45, %v532_v44  ;;  %v802_v61 = vld [vmem:[#allocation2 + $0x39] sm:$0xff]  ;;  %v803_v63 = vld [vmem:[#allocation2 + $0x41] sm:$0xff]  ;;  %v944_v9 = vld [vmem:[#allocation2 + $0xcc] sm:$0xff] }
  0x2e   : > { %v809_v2 = vpack.c.bf16 %v804_v0, %v803_v63  ;;  %v5212_v5 = vld [vmem:[%s6406_s2 + $0x80] sm:$0xff]   ;;  %v5213_v7 = vld [vmem:[%s6406_s2 + $0x88] sm:$0xff]   ;;  %v5214_v11 = vld [vmem:[%s6406_s2 + $0x90] sm:$0xff]  }
  0x2f   : > { %4292 = vmatmul.mubr.msk.bf16.vlgmr.msra.gmra.mrb[0].mxu0 %vm478_vm1, %v534_v59  ;;  %v807_v59 = vpack.c.bf16 %v800_v57, %v799_v56  ;;  %v943_v8 = vld [vmem:[#allocation2 + $0xc4] sm:$0xff]  ;;  %v945_v12 = vld [vmem:[#allocation2 + $0xd4] sm:$0xff]  ;;  %v946_v13 = vld [vmem:[#allocation2 + $0xdc] sm:$0xff] }
  0x30   : > { %4312 = vmatpush3.bf16.msra.mxu0 %v5204_v60  ;;  %4295 = vmatprep.mubr.msk.bf16.mxu0 %vm5319_vm0, %v5318_v1  ;;  %v801_v60 = vld [vmem:[#allocation2 + $0x31] sm:$0xff]  ;;  %v952_v10 = vpack.c.bf16 %v944_v9, %v943_v8  ;;  %v953_v15 = vpack.c.bf16 %v946_v13, %v945_v12  ;;  %v947_v16 = vld [vmem:[#allocation2 + $0xe4] sm:$0xff] }
  0x31   : > { %4313 = vmatprep.subr.bf16.mxu0 %v5318_v1  ;;  %v808_v62 = vpack.c.bf16 %v802_v61, %v801_v60  ;;  %v5215_v14 = vld [vmem:[%s6406_s2 + $0x98] sm:$0xff]   ;;  %v948_v17 = vld [vmem:[#allocation2 + $0xec] sm:$0xff]  ;;  %v404_v21 = vld [vmem:[%s5420_s30 + $0x80] sm:$0xff] }
  0x32   : > { %v954_v18 = vpack.c.bf16 %v948_v17, %v947_v16  ;;  %v449_v23 = vmax.f32 %v404_v21, 0.0  ;;  %v1087_v24 = vld [vmem:[#allocation2 + $0x10e] sm:$0xff]  ;;  %v1088_v25 = vld [vmem:[#allocation2 + $0x116] sm:$0xff]  ;;  %v5216_v31 = vld [vmem:[%s6406_s2 + $0xa0] sm:$0xff]  }
  0x33   : > { %v405_v26 = vld [vmem:[%s5420_s30 + $0x88] sm:$0xff]  ;;  %v406_v27 = vld [vmem:[%s5420_s30 + $0x90] sm:$0xff]  ;;  %v1089_v32 = vld [vmem:[#allocation2 + $0x11e] sm:$0xff] }
  0x34   : > { %4314 = vmatpush3.bf16.msra.mxu0 %v5205_v4  ;;  %v942_v4 = vld [vmem:[#allocation2 + $0xbc] sm:$0xff]  ;;  %495 = vst.msk [vmem:[#allocation2 + $0x80] sm:$0xff] %vm478_vm1, %v449_v23  ;;  %v450_v29 = vmax.f32 %v405_v26, 0.0  ;;  %v451_v30 = vmax.f32 %v406_v27, 0.0  ;;  %v1090_v33 = vld [vmem:[#allocation2 + $0x126] sm:$0xff]  ;;  %v5218_v40 = vld [vmem:[%s6406_s2 + $0xb0] sm:$0xff]  }
  0x35   : > { %4315 = vmatprep.subr.bf16.mxu0 %v5318_v1  ;;  %v951_v6 = vpack.c.bf16 %v942_v4, %v941_v3  ;;  %v5217_v34 = vld [vmem:[%s6406_s2 + $0xa8] sm:$0xff]   ;;  %v407_v35 = vld [vmem:[%s5420_s30 + $0x98] sm:$0xff]  ;;  %v408_v36 = vld [vmem:[%s5420_s30 + $0xa0] sm:$0xff] }
  0x36   : > { %496 = vst.msk [vmem:[#allocation2 + $0x88] sm:$0xff] %vm478_vm1, %v450_v29  ;;  %497 = vst.msk [vmem:[#allocation2 + $0x90] sm:$0xff] %vm478_vm1, %v451_v30  ;;  %v452_v38 = vmax.f32 %v407_v35, 0.0  ;;  %v453_v39 = vmax.f32 %v408_v36, 0.0  ;;  %v1091_v41 = vld [vmem:[#allocation2 + $0x12e] sm:$0xff]  ;;  %v1092_v42 = vld [vmem:[#allocation2 + $0x136] sm:$0xff] }
  0x37   : > { %4296 = vmatmul.mubr.msk.bf16.gmra.mrb[4].mxu0 %vm478_vm1, %v535_v19  ;;  %v949_v19 = vld [vmem:[#allocation2 + $0xf4] sm:$0xff]  ;;  %v409_v44 = vld [vmem:[%s5420_s30 + $0xa8] sm:$0xff]  ;;  %v1099_v45 = vpack.c.bf16 %v1092_v42, %v1091_v41  ;;  %v1093_v47 = vld [vmem:[#allocation2 + $0x13e] sm:$0xff] }
  0x38   : > { %4299 = vmatprep.mubr.msk.bf16.mxu0 %vm5319_vm0, %v5318_v1  ;;  %4316 = vmatpush3.bf16.msra.mxu0 %v5206_v20  ;;  %v950_v20 = vld [vmem:[#allocation2 + $0xfc] sm:$0xff]  ;;  %498 = vst.msk [vmem:[#allocation2 + $0x98] sm:$0xff] %vm478_vm1, %v452_v38  ;;  %499 = vst.msk [vmem:[#allocation2 + $0xa0] sm:$0xff] %vm478_vm1, %v453_v39  ;;  %v1094_v48 = vld [vmem:[#allocation2 + $0x146] sm:$0xff] }
  0x39   : > { %4317 = vmatprep.subr.bf16.mxu0 %v5318_v1  ;;  %v955_v22 = vpack.c.bf16 %v950_v20, %v949_v19  ;;  %v1096_v51 = vld [vmem:[#allocation2 + $0x156] sm:$0xff]  ;;  %v5220_v56 = vld [vmem:[%s6406_s2 + $0xc0] sm:$0xff]   ;;  %v1236_v60 = vld [vmem:[#allocation2 + $0xcd] sm:$0xff]  ;;  %v5320_v19 = vmov 0  }
  0x3a   : > { %v5221_v61 = vld [vmem:[%s6406_s2 + $0xc8] sm:$0xff]   ;;  %v5222_v0 = vld [vmem:[%s6406_s2 + $0xd0] sm:$0xff]   ;;  %5194 = vset.pattern.permute.xlu0 %v5320_v19  ;;  %5195 = vset.pattern.permute.xlu1 %v5320_v19  ;;  %v5232_v21 = vld [vmem:[%s6409_s5 + $0x40] sm:$0xff]  }
  0x3b   : > { %v551_v57 = vld [vmem:[#allocation2 + $0x7a] sm:$0xff]  ;;  %v1240_v12 = vld [vmem:[#allocation2 + $0xed] sm:$0xff] }
  0x3c   : > { %4318 = vmatpush3.bf16.msra.mxu0 %v5207_v28  ;;  %v1097_v28 = vpack.c.bf16 %v1088_v25, %v1087_v24  ;;  %v1237_v4 = vld [vmem:[#allocation2 + $0xd5] sm:$0xff]  ;;  %v1862_v20 = vld [vmem:[%s6405_s1 + $0x8] sm:$0xff]  ;;  %v1865_v25 = vld [vmem:[%s6405_s1 + $0x20] sm:$0xff] }
  0x3d   : > { %4339 = vmatprep.subr.bf16.mxu0 %v5318_v1  ;;  %v1863_v16 = vld [vmem:[%s6405_s1 + $0x10] sm:$0xff]  ;;  %v1864_v23 = vld [vmem:[%s6405_s1 + $0x18] sm:$0xff]  ;;  %v5233_v24 = vld [vmem:[%s6409_s5 + $0x48] sm:$0xff]  }
  0x3e   : > { %v1241_v17 = vld [vmem:[#allocation2 + $0xf5] sm:$0xff]  ;;  %1883 = vperm.xlu1 %5195, %v1863_v16   ;;  %v1866_v26 = vld [vmem:[%s6405_s1 + $0x28] sm:$0xff] }
  0x3f   : > { %4300 = vmatmul.mubr.msk.bf16.gmra.mrb[8].mxu0 %vm478_vm1, %v536_v37  ;;  %v1098_v37 = vpack.c.bf16 %v1090_v33, %v1089_v32  ;;  %v554_v3 = vld [vmem:[#allocation2 + $0x92] sm:$0xff]  ;;  %v555_v9 = vld [vmem:[#allocation2 + $0x9a] sm:$0xff]  ;;  %v1379_v27 = vld [vmem:[#allocation2 + $0xa] sm:$0xff] }
  0x40   : > { %4303 = vmatprep.mubr.msk.bf16.mxu0 %vm5319_vm0, %v5318_v1  ;;  %v5234_v29 = vld [vmem:[%s6409_s5 + $0x50] sm:$0xff]   ;;  %v1868_v32 = vld [vmem:[%s6405_s1 + $0x38] sm:$0xff]  ;;  %v5224_v33 = vld [vmem:[%s6406_s2 + $0xe0] sm:$0xff]  }
  0x41   : > { %v1867_v30 = vld [vmem:[%s6405_s1 + $0x30] sm:$0xff]  ;;  %v1870_v35 = vld [vmem:[%s6405_s1 + $0x48] sm:$0xff]  ;;  %v1381_v36 = vld [vmem:[#allocation2 + $0x1a] sm:$0xff] }
  0x42   : > { %1888 = vperm.xlu1 %5195, %v1864_v23   ;;  %v5225_v38 = vld [vmem:[%s6406_s2 + $0xe8] sm:$0xff]   ;;  %v1384_v42 = vld [vmem:[#allocation2 + $0x32] sm:$0xff]  ;;  %v1677_v16 = vld [vmem:[#allocation2 + $0x3b] sm:$0xff] }
  0x43   : > { %v1383_v41 = vld [vmem:[#allocation2 + $0x2a] sm:$0xff]  ;;  %v5236_v23 = vld [vmem:[%s6409_s5 + $0x60] sm:$0xff]  }
  0x44   : > { %v1679_v19 = vld [vmem:[#allocation2 + $0x4b] sm:$0xff] }
  0x46   : > { %1898 = vperm.xlu1 %5195, %v1866_v26  }
  0x47   : > { %4304 = vmatmul.mubr.msk.bf16.gmra.mrb[12].mxu0 %vm478_vm1, %v537_v43  ;;  %v5219_v43 = vld [vmem:[%s6406_s2 + $0xb8] sm:$0xff]  }
  0x48   : > { %4307 = vmatprep.mubr.msk.bf16.mxu0 %vm5319_vm0, %v5318_v1 }
  0x4a   : > { %1908 = vperm.xlu1 %5195, %v1868_v32  }
  0x4e   : > { %1918 = vperm.xlu1 %5195, %v1870_v35  }
  0x4f   : > { %4308 = vmatmul.mubr.msk.bf16.gmra.mrb[16].mxu0 %vm478_vm1, %v538_v46  ;;  %v454_v46 = vmax.f32 %v409_v44, 0.0  ;;  %v1391_v44 = vpack.c.bf16 %v1384_v42, %v1383_v41  ;;  %v5858_v41 = vld [vmem:[%s6408_s4] ss:$0 sm:$0xff] }
  0x50   : > { %4319 = vmatprep.mubr.msk.bf16.mxu0 %vm5319_vm0, %v5318_v1 }
  0x51   : > { %500 = vst.msk [vmem:[#allocation2 + $0xa8] sm:$0xff] %vm478_vm1, %v454_v46  ;;  %v1386_v46 = vld [vmem:[#allocation2 + $0x42] sm:$0xff] }
  0x57   : > { %4320 = vmatmul.mubr.msk.bf16.vlgmr.msra.gmra.mrb[0].mxu0 %vm478_vm1, %v805_v50  ;;  %v1095_v50 = vld [vmem:[#allocation2 + $0x14e] sm:$0xff] }
  0x58   : > { %4340 = vmatpush3.bf16.msra.mxu0 %v5208_v49  ;;  %4323 = vmatprep.mubr.msk.bf16.mxu0 %vm5319_vm0, %v5318_v1  ;;  %v1100_v49 = vpack.c.bf16 %v1094_v48, %v1093_v47  ;;  %v1101_v52 = vpack.c.bf16 %v1096_v51, %v1095_v50  ;;  %v1387_v48 = vld [vmem:[#allocation2 + $0x4a] sm:$0xff] }
  0x59   : > { %4341 = vmatprep.subr.bf16.mxu0 %v5318_v1  ;;  %v1525_v51 = vld [vmem:[#allocation2 + $0x64] sm:$0xff] }
  0x5c   : > { %4342 = vmatpush3.bf16.msra.mxu0 %v5209_v53  ;;  %v1233_v53 = vld [vmem:[#allocation2 + $0xb5] sm:$0xff] }
  0x5d   : > { %4343 = vmatprep.subr.bf16.mxu0 %v5318_v1 }
  0x5f   : > { %4324 = vmatmul.mubr.msk.bf16.gmra.mrb[4].mxu0 %vm478_vm1, %v806_v55 }
  0x60   : > { %4327 = vmatprep.mubr.msk.bf16.mxu0 %vm5319_vm0, %v5318_v1  ;;  %4344 = vmatpush3.bf16.msra.mxu0 %v5210_v54  ;;  %v1234_v54 = vld [vmem:[#allocation2 + $0xbd] sm:$0xff] }
  0x61   : > { %4345 = vmatprep.subr.bf16.mxu0 %v5318_v1  ;;  %v1243_v55 = vpack.c.bf16 %v1234_v54, %v1233_v53  ;;  %v5228_v54 = vld [vmem:[%s6406_s2 + $0x100] sm:$0xff]  }
  0x64   : > { %4346 = vmatpush3.bf16.msra.mxu0 %v5211_v58  ;;  %v552_v58 = vld [vmem:[#allocation2 + $0x82] sm:$0xff] }
  0x65   : > { %4367 = vmatprep.subr.bf16.mxu0 %v5318_v1 }
  0x67   : > { %4328 = vmatmul.mubr.msk.bf16.gmra.mrb[8].mxu0 %vm478_vm1, %v807_v59  ;;  %v1235_v59 = vld [vmem:[#allocation2 + $0xc5] sm:$0xff] }
  0x68   : > { %4331 = vmatprep.mubr.msk.bf16.mxu0 %vm5319_vm0, %v5318_v1  ;;  %v1244_v63 = vpack.c.bf16 %v1236_v60, %v1235_v59  ;;  %v5230_v59 = vld [vmem:[%s6406_s2 + $0x110] sm:$0xff]   ;;  %v1529_v60 = vld [vmem:[#allocation2 + $0x84] sm:$0xff] }
  0x6f   : > { %4332 = vmatmul.mubr.msk.bf16.gmra.mrb[12].mxu0 %vm478_vm1, %v808_v62  ;;  %v559_v62 = vpack.c.bf16 %v552_v58, %v551_v57  ;;  %v5229_v57 = vld [vmem:[%s6406_s2 + $0x108] sm:$0xff]  }
  0x70   : > { %4335 = vmatprep.mubr.msk.bf16.mxu0 %vm5319_vm0, %v5318_v1 }
  0x71   : > { %4272 = vmatmul.mubr.msk.bf16.vlgmr.msra.gmra.mrb[0].mxu1 %vm478_vm1, %v559_v62  ;;  %v5231_v62 = vld [vmem:[%s6406_s2 + $0x118] sm:$0xff]  }
  0x72   : > { %4508 = vmatpush3.bf16.msra.mxu1 %v5232_v21 }
  0x77   : > { %4336 = vmatmul.mubr.msk.bf16.gmra.mrb[16].mxu0 %vm478_vm1, %v809_v2  ;;  %v553_v2 = vld [vmem:[#allocation2 + $0x8a] sm:$0xff] }
  0x78   : > { %4347 = vmatprep.mubr.msk.bf16.mxu0 %vm5319_vm0, %v5318_v1 }
  0x7f   : > { %4348 = vmatmul.mubr.msk.bf16.vlgmr.msra.gmra.mrb[0].mxu0 %vm478_vm1, %v951_v6  ;;  %v5223_v6 = vld [vmem:[%s6406_s2 + $0xd8] sm:$0xff]  }
  0x80   : > { %4368 = vmatpush3.bf16.msra.mxu0 %v5212_v5  ;;  %4351 = vmatprep.mubr.msk.bf16.mxu0 %vm5319_vm0, %v5318_v1  ;;  %v1238_v5 = vld [vmem:[#allocation2 + $0xdd] sm:$0xff] }
  0x81   : > { %4369 = vmatprep.subr.bf16.mxu0 %v5318_v1  ;;  %v1245_v8 = vpack.c.bf16 %v1238_v5, %v1237_v4  ;;  %v1533_v4 = vld [vmem:[#allocation2 + $0xa4] sm:$0xff]  ;;  %v1534_v5 = vld [vmem:[#allocation2 + $0xac] sm:$0xff] }
  0x84   : > { %4370 = vmatpush3.bf16.msra.mxu0 %v5213_v7  ;;  %v560_v7 = vpack.c.bf16 %v554_v3, %v553_v2  ;;  %v1532_v2 = vld [vmem:[#allocation2 + $0x9c] sm:$0xff] }
  0x85   : > { %4371 = vmatprep.subr.bf16.mxu0 %v5318_v1 }
  0x87   : > { %4352 = vmatmul.mubr.msk.bf16.gmra.mrb[4].mxu0 %vm478_vm1, %v952_v10  ;;  %v556_v10 = vld [vmem:[#allocation2 + $0xa2] sm:$0xff] }
  0x88   : > { %4355 = vmatprep.mubr.msk.bf16.mxu0 %vm5319_vm0, %v5318_v1  ;;  %4372 = vmatpush3.bf16.msra.mxu0 %v5214_v11  ;;  %v1239_v11 = vld [vmem:[#allocation2 + $0xe5] sm:$0xff]  ;;  %v561_v13 = vpack.c.bf16 %v556_v10, %v555_v9  ;;  %v1673_v10 = vld [vmem:[#allocation2 + $0x1b] sm:$0xff] }
  0x89   : > { %4373 = vmatprep.subr.bf16.mxu0 %v5318_v1 }
  0x8c   : > { %4374 = vmatpush3.bf16.msra.mxu0 %v5215_v14  ;;  %v1246_v14 = vpack.c.bf16 %v1240_v12, %v1239_v11  ;;  %v1674_v11 = vld [vmem:[#allocation2 + $0x23] sm:$0xff] }
  0x8d   : > { %4395 = vmatprep.subr.bf16.mxu0 %v5318_v1  ;;  %v1682_v12 = vpack.c.bf16 %v1674_v11, %v1673_v10 }
  0x8f   : > { %4356 = vmatmul.mubr.msk.bf16.gmra.mrb[8].mxu0 %vm478_vm1, %v953_v15  ;;  %v1861_v15 = vld [vmem:[%s6405_s1] sm:$0xff] }
  0x90   : > { %4359 = vmatprep.mubr.msk.bf16.mxu0 %vm5319_vm0, %v5318_v1  ;;  %1873 = vperm.xlu0 %5194, %v1861_v15  }
  0x94   : > { %1878 = vperm.xlu0 %5194, %v1862_v20   ;;  %v1680_v20 = vld [vmem:[#allocation2 + $0x53] sm:$0xff] }
  0x95   : > { %v1685_v21 = vpack.c.bf16 %v1680_v20, %v1679_v19  ;;  %v5241_v19 = vld [vmem:[%s6409_s5 + $0x8] sm:$0xff]  }
  0x97   : > { %4360 = vmatmul.mubr.msk.bf16.gmra.mrb[12].mxu0 %vm478_vm1, %v954_v18  ;;  %v1242_v18 = vld [vmem:[#allocation2 + $0xfd] sm:$0xff] }
  0x98   : > { %4363 = vmatprep.mubr.msk.bf16.mxu0 %vm5319_vm0, %v5318_v1  ;;  %1893 = vperm.xlu0 %5194, %v1865_v25   ;;  %v5238_v25 = vld [vmem:[%s6409_s5 + $0x70] sm:$0xff]  }
  0x9c   : > { %1903 = vperm.xlu0 %5194, %v1867_v30  }
  0x9f   : > { %4364 = vmatmul.mubr.msk.bf16.gmra.mrb[16].mxu0 %vm478_vm1, %v955_v22  ;;  %v1247_v22 = vpack.c.bf16 %v1242_v18, %v1241_v17  ;;  %v1678_v17 = vld [vmem:[#allocation2 + $0x43] sm:$0xff] }
  0xa0   : > { %4375 = vmatprep.mubr.msk.bf16.mxu0 %vm5319_vm0, %v5318_v1  ;;  %v5628_v1 = vld [vmem:[#allocation3] sm:$0xff]  ;;  %v1684_v18 = vpack.c.bf16 %v1678_v17, %v1677_v16 }
  0xa1   : > { %4275 = vmatprep.mubr.msk.bf16.mxu1 %vm5319_vm0, %v5628_v1  ;;  %4509 = vmatprep.subr.bf16.mxu1 %v5628_v1 }
  0xa2   : > { %4276 = vmatmul.mubr.msk.bf16.gmra.mrb[4].mxu1 %vm478_vm1, %v560_v7  ;;  %v1671_v7 = vld [vmem:[#allocation2 + $0xb] sm:$0xff] }
  0xa3   : > { %4279 = vmatprep.mubr.msk.bf16.mxu1 %vm5319_vm0, %v5628_v1  ;;  %4510 = vmatpush3.bf16.msra.mxu1 %v5233_v24  ;;  %v5237_v24 = vld [vmem:[%s6409_s5 + $0x68] sm:$0xff]  }
  0xa4   : > { %4511 = vmatprep.subr.bf16.mxu1 %v5628_v1 }
  0xa7   : > { %4376 = vmatmul.mubr.msk.bf16.vlgmr.msra.gmra.mrb[0].mxu0 %vm478_vm1, %v1097_v28  ;;  %v1380_v28 = vld [vmem:[#allocation2 + $0x12] sm:$0xff]  ;;  %4512 = vmatpush3.bf16.msra.mxu1 %v5234_v29 }
  0xa8   : > { %4396 = vmatpush3.bf16.msra.mxu0 %v5216_v31  ;;  %4379 = vmatprep.mubr.msk.bf16.mxu0 %vm5319_vm0, %v5628_v1  ;;  %v1389_v31 = vpack.c.bf16 %v1380_v28, %v1379_v27  ;;  %v5239_v28 = vld [vmem:[%s6409_s5 + $0x78] sm:$0xff]  }
  0xa9   : > { %4397 = vmatprep.subr.bf16.mxu0 %v5628_v1  ;;  %4513 = vmatprep.subr.bf16.mxu1 %v5628_v1 }
  0xaa   : > { %4280 = vmatmul.mubr.msk.bf16.gmra.mrb[8].mxu1 %vm478_vm1, %v561_v13  ;;  %v1675_v13 = vld [vmem:[#allocation2 + $0x2b] sm:$0xff] }
  0xab   : > { %4523 = vmatprep.mubr.msk.bf16.mxu1 %vm5319_vm0, %v5628_v1 }
  0xac   : > { %4398 = vmatpush3.bf16.msra.mxu0 %v5217_v34  ;;  %v1869_v34 = vld [vmem:[%s6405_s1 + $0x40] sm:$0xff] }
  0xad   : > { %4399 = vmatprep.subr.bf16.mxu0 %v5628_v1  ;;  %1913 = vperm.xlu0 %5194, %v1869_v34  }
  0xaf   : > { %4380 = vmatmul.mubr.msk.bf16.gmra.mrb[4].mxu0 %vm478_vm1, %v1098_v37  ;;  %v1382_v37 = vld [vmem:[#allocation2 + $0x22] sm:$0xff] }
  0xb0   : > { %4383 = vmatprep.mubr.msk.bf16.mxu0 %vm5319_vm0, %v5628_v1  ;;  %4400 = vmatpush3.bf16.msra.mxu0 %v5218_v40  ;;  %v1390_v39 = vpack.c.bf16 %v1382_v37, %v1381_v36  ;;  %v5226_v40 = vld [vmem:[%s6406_s2 + $0xf0] sm:$0xff]  }
  0xb1   : > { %4401 = vmatprep.subr.bf16.mxu0 %v5628_v1 }
  0xb4   : > { %4402 = vmatpush3.bf16.msra.mxu0 %v5219_v43  ;;  %v5227_v43 = vld [vmem:[%s6406_s2 + $0xf8] sm:$0xff]  }
  0xb5   : > { %4423 = vmatprep.subr.bf16.mxu0 %v5628_v1 }
  0xb7   : > { %4384 = vmatmul.mubr.msk.bf16.gmra.mrb[8].mxu0 %vm478_vm1, %v1099_v45  ;;  %v1385_v45 = vld [vmem:[#allocation2 + $0x3a] sm:$0xff] }
  0xb8   : > { %4387 = vmatprep.mubr.msk.bf16.mxu0 %vm5319_vm0, %v5628_v1  ;;  %v1392_v47 = vpack.c.bf16 %v1386_v46, %v1385_v45 }
  0xbf   : > { %4388 = vmatmul.mubr.msk.bf16.gmra.mrb[12].mxu0 %vm478_vm1, %v1100_v49  ;;  %v1388_v49 = vld [vmem:[#allocation2 + $0x52] sm:$0xff] }
  0xc0   : > { %4391 = vmatprep.mubr.msk.bf16.mxu0 %vm5319_vm0, %v5628_v1  ;;  %v1393_v50 = vpack.c.bf16 %v1388_v49, %v1387_v48 }
  0xc7   : > { %4392 = vmatmul.mubr.msk.bf16.gmra.mrb[16].mxu0 %vm478_vm1, %v1101_v52  ;;  %v1526_v52 = vld [vmem:[#allocation2 + $0x6c] sm:$0xff] }
  0xc8   : > { %4403 = vmatprep.mubr.msk.bf16.mxu0 %vm5319_vm0, %v5628_v1  ;;  %v1535_v53 = vpack.c.bf16 %v1526_v52, %v1525_v51 }
  0xcf   : > { %4404 = vmatmul.mubr.msk.bf16.vlgmr.msra.gmra.mrb[0].mxu0 %vm478_vm1, %v1243_v55  ;;  %v1527_v55 = vld [vmem:[#allocation2 + $0x74] sm:$0xff] }
  0xd0   : > { %4424 = vmatpush3.bf16.msra.mxu0 %v5220_v56  ;;  %4407 = vmatprep.mubr.msk.bf16.mxu0 %vm5319_vm0, %v5628_v1  ;;  %v1528_v56 = vld [vmem:[#allocation2 + $0x7c] sm:$0xff] }
  0xd1   : > { %4425 = vmatprep.subr.bf16.mxu0 %v5628_v1  ;;  %v1536_v58 = vpack.c.bf16 %v1528_v56, %v1527_v55 }
  0xd4   : > { %4426 = vmatpush3.bf16.msra.mxu0 %v5221_v61  ;;  %v1530_v61 = vld [vmem:[#allocation2 + $0x8c] sm:$0xff] }
  0xd5   : > { %4427 = vmatprep.subr.bf16.mxu0 %v5628_v1 }
  0xd7   : > { %4408 = vmatmul.mubr.msk.bf16.gmra.mrb[4].mxu0 %vm478_vm1, %v1244_v63  ;;  %v1537_v63 = vpack.c.bf16 %v1530_v61, %v1529_v60 }
  0xd8   : > { %4411 = vmatprep.mubr.msk.bf16.mxu0 %vm5319_vm0, %v5628_v1  ;;  %4428 = vmatpush3.bf16.msra.mxu0 %v5222_v0  ;;  %v1531_v0 = vld [vmem:[#allocation2 + $0x94] sm:$0xff] }
  0xd9   : > { %4429 = vmatprep.subr.bf16.mxu0 %v5628_v1  ;;  %v1538_v3 = vpack.c.bf16 %v1532_v2, %v1531_v0 }
  0xdc   : > { %4430 = vmatpush3.bf16.msra.mxu0 %v5223_v6  ;;  %v1539_v6 = vpack.c.bf16 %v1534_v5, %v1533_v4 }
  0xdd   : > { %4451 = vmatprep.subr.bf16.mxu0 %v5628_v1 }
  0xdf   : > { %4412 = vmatmul.mubr.msk.bf16.gmra.mrb[8].mxu0 %vm478_vm1, %v1245_v8  ;;  %v1672_v8 = vld [vmem:[#allocation2 + $0x13] sm:$0xff] }
  0xe0   : > { %4415 = vmatprep.mubr.msk.bf16.mxu0 %vm5319_vm0, %v5628_v1  ;;  %v1681_v9 = vpack.c.bf16 %v1672_v8, %v1671_v7 }
  0xe7   : > { %4416 = vmatmul.mubr.msk.bf16.gmra.mrb[12].mxu0 %vm478_vm1, %v1246_v14  ;;  %v1676_v14 = vld [vmem:[#allocation2 + $0x33] sm:$0xff] }
  0xe8   : > { %4419 = vmatprep.mubr.msk.bf16.mxu0 %vm5319_vm0, %v5628_v1  ;;  %v1683_v15 = vpack.c.bf16 %v1676_v14, %v1675_v13 }
  0xef   : > { %4420 = vmatmul.mubr.msk.bf16.gmra.mrb[16].mxu0 %vm478_vm1, %v1247_v22  ;;  %v5235_v22 = vld [vmem:[%s6409_s5 + $0x58] sm:$0xff]  }
  0xf0   : > { %4431 = vmatprep.mubr.msk.bf16.mxu0 %vm5319_vm0, %v5628_v1  ;;  %4514 = vmatpush3.bf16.msra.mxu1 %v5235_v22 }
  0xf1   : > { %4515 = vmatprep.subr.bf16.mxu1 %v5628_v1 }
  0xf4   : > { %4516 = vmatpush3.bf16.msra.mxu1 %v5236_v23 }
  0xf5   : > { %4517 = vmatprep.subr.bf16.mxu1 %v5628_v1 }
  0xf7   : > { %4432 = vmatmul.mubr.msk.bf16.vlgmr.msra.gmra.mrb[0].mxu0 %vm478_vm1, %v1389_v31 }
  0xf8   : > { %4452 = vmatpush3.bf16.msra.mxu0 %v5224_v33  ;;  %4435 = vmatprep.mubr.msk.bf16.mxu0 %vm5319_vm0, %v5628_v1 }
  0xf9   : > { %4453 = vmatprep.subr.bf16.mxu0 %v5628_v1  ;;  %4518 = vmatpush3.bf16.msra.mxu1 %v5237_v24 }
  0xfa   : > { %4519 = vmatprep.subr.bf16.mxu1 %v5628_v1 }
  0xfc   : > { %4454 = vmatpush3.bf16.msra.mxu0 %v5225_v38 }
  0xfd   : > { %4455 = vmatprep.subr.bf16.mxu0 %v5628_v1  ;;  %4520 = vmatpush3.bf16.msra.mxu1 %v5238_v25 }
  0xfe   : > { %4521 = vmatprep.subr.bf16.mxu1 %v5628_v1 }
  0xff   : > { %4436 = vmatmul.mubr.msk.bf16.gmra.mrb[4].mxu0 %vm478_vm1, %v1390_v39  ;;  %v5853_v39 = vld [vmem:[%s6407_s3] ss:$0 sm:$0xff] }
 0x100   : > { %4439 = vmatprep.mubr.msk.bf16.mxu0 %vm5319_vm0, %v5628_v1  ;;  %4456 = vmatpush3.bf16.msra.mxu0 %v5226_v40 }
 0x101   : > { %4457 = vmatprep.subr.bf16.mxu0 %v5628_v1  ;;  %4522 = vmatpush3.bf16.msra.mxu1 %v5239_v28  ;;  %v5242_v28 = vld [vmem:[%s6409_s5 + $0x10] sm:$0xff]  }
 0x102   : > { %4543 = vmatprep.subr.bf16.mxu1 %v5628_v1 }
 0x104   : > { %4458 = vmatpush3.bf16.msra.mxu0 %v5227_v43 }
 0x105   : > { %4479 = vmatprep.subr.bf16.mxu0 %v5628_v1 }
 0x107   : > { %4440 = vmatmul.mubr.msk.bf16.gmra.mrb[8].mxu0 %vm478_vm1, %v1391_v44 }
 0x108   : > { %4443 = vmatprep.mubr.msk.bf16.mxu0 %vm5319_vm0, %v5628_v1 }
 0x10f   : > { %4444 = vmatmul.mubr.msk.bf16.gmra.mrb[12].mxu0 %vm478_vm1, %v1392_v47  ;;  %v1874_v44 = vpop.permute.xlu0 %1873 }
 0x110   : > { %4447 = vmatprep.mubr.msk.bf16.mxu0 %vm5319_vm0, %v5628_v1 }
 0x117   : > { %4448 = vmatmul.mubr.msk.bf16.gmra.mrb[16].mxu0 %vm478_vm1, %v1393_v50 }
 0x118   : > { %4459 = vmatprep.mubr.msk.bf16.mxu0 %vm5319_vm0, %v5628_v1 }
 0x11f   : > { %4460 = vmatmul.mubr.msk.bf16.vlgmr.msra.gmra.mrb[0].mxu0 %vm478_vm1, %v1535_v53  ;;  %v1879_v53 = vpop.permute.xlu0 %1878 }
 0x120   : > { %4480 = vmatpush3.bf16.msra.mxu0 %v5228_v54  ;;  %4463 = vmatprep.mubr.msk.bf16.mxu0 %vm5319_vm0, %v5628_v1 }
 0x121   : > { %4481 = vmatprep.subr.bf16.mxu0 %v5628_v1 }
 0x123   : > { %v1894_v24 = vpop.permute.xlu0 %1893 }
 0x124   : > { %4482 = vmatpush3.bf16.msra.mxu0 %v5229_v57 }
 0x125   : > { %4483 = vmatprep.subr.bf16.mxu0 %v5628_v1 }
 0x127   : > { %4464 = vmatmul.mubr.msk.bf16.gmra.mrb[4].mxu0 %vm478_vm1, %v1536_v58  ;;  %v1884_v58 = vpop.permute.xlu1 %1883 }
 0x128   : > { %4467 = vmatprep.mubr.msk.bf16.mxu0 %vm5319_vm0, %v5628_v1  ;;  %4484 = vmatpush3.bf16.msra.mxu0 %v5230_v59 }
 0x129   : > { %4485 = vmatprep.subr.bf16.mxu0 %v5628_v1 }
 0x12c   : > { %4486 = vmatpush3.bf16.msra.mxu0 %v5231_v62 }
 0x12d   : > { %4831 = vmatprep.subr.bf16.mxu0 %v5628_v1 }
 0x12f   : > { %4468 = vmatmul.mubr.msk.bf16.gmra.mrb[8].mxu0 %vm478_vm1, %v1537_v63 }
 0x130   : > { %4471 = vmatprep.mubr.msk.bf16.mxu0 %vm5319_vm0, %v5628_v1 }
 0x137   : > { %4472 = vmatmul.mubr.msk.bf16.gmra.mrb[12].mxu0 %vm478_vm1, %v1538_v3  ;;  %v1986_v3 = vld [vmem:[#allocation3 + $0x6] sm:$0xff] }
 0x138   : > { %4475 = vmatprep.mubr.msk.bf16.mxu0 %vm5319_vm0, %v5628_v1 }
 0x13f   : > { %4476 = vmatmul.mubr.msk.bf16.gmra.mrb[16].mxu0 %vm478_vm1, %v1539_v6  ;;  %v1889_v6 = vpop.permute.xlu1 %1888 }
 0x140   : > { %4487 = vmatprep.mubr.msk.bf16.mxu0 %vm5319_vm0, %v5628_v1 }
 0x144   : > { %v660_v26 = vpop.f32.mrb[0].mxu1 }
 0x145   : > { %v4273_v27 = vpop.f32.mrb[1].mxu1 }
 0x146   : > { %v663_v29 = vpop.f32.mrb[2].mxu1 }
 0x147   : > { %4488 = vmatmul.mubr.msk.bf16.vlgmr.msra.gmra.mrb[0].mxu0 %vm478_vm1, %v1681_v9  ;;  %v4274_v30 = vpop.f32.mrb[3].mxu1  ;;  %v5240_v9 = vld [vmem:[%s6409_s5] sm:$0xff]  }
 0x148   : > { %4491 = vmatprep.mubr.msk.bf16.mxu0 %vm5319_vm0, %v5628_v1 }
 0x14f   : > { %4492 = vmatmul.mubr.msk.bf16.gmra.mrb[4].mxu0 %vm478_vm1, %v1682_v12 }
 0x150   : > { %4495 = vmatprep.mubr.msk.bf16.mxu0 %vm5319_vm0, %v5628_v1 }
 0x157   : > { %4496 = vmatmul.mubr.msk.bf16.gmra.mrb[8].mxu0 %vm478_vm1, %v1683_v15 }
 0x158   : > { %4499 = vmatprep.mubr.msk.bf16.mxu0 %vm5319_vm0, %v5628_v1 }
 0x15f   : > { %4500 = vmatmul.mubr.msk.bf16.gmra.mrb[12].mxu0 %vm478_vm1, %v1684_v18 }
 0x160   : > { %4503 = vmatprep.mubr.msk.bf16.mxu0 %vm5319_vm0, %v5628_v1 }
 0x167   : > { %4504 = vmatmul.mubr.msk.bf16.gmra.mrb[16].mxu0 %vm478_vm1, %v1685_v21 }
 0x168   : > { %4839 = vmatprep.mubr.msk.bf16.mxu0 %vm5319_vm0, %v5628_v1 }
 0x175   : > { %v5842_v31 = vpop.f32.mrb[4].mxu1 }
 0x176   : > { %v4277_v32 = vpop.f32.mrb[5].mxu1 }
 0x177   : > { %v5844_v33 = vpop.f32.mrb[6].mxu1 }
 0x178   : > { %v4278_v34 = vpop.f32.mrb[7].mxu1 }
 0x17d   : > { %v5846_v35 = vpop.f32.mrb[8].mxu1 }
 0x17e   : > { %v4281_v36 = vpop.f32.mrb[9].mxu1 }
 0x17f   : > { %v5848_v37 = vpop.f32.mrb[10].mxu1 }
 0x180   : > { %v4282_v38 = vpop.f32.mrb[11].mxu1 }
 0x181   : > { %v1899_v38 = vpop.permute.xlu1 %1898 }
 0x21a   : > { %v1768_v40 = vpop.f32.mrb[0].mxu0 }
 0x21b   : > { %v1824_v42 = vmul.f32 %v5853_v39, %v1768_v40  ;;  %v4489_v43 = vpop.f32.mrb[1].mxu0 }
 0x21c   : > { %v1771_v45 = vpop.f32.mrb[2].mxu0 }
 0x21d   : > { %v1841_v46 = vadd.f32 %v5858_v41, %v1824_v42  ;;  %v1825_v47 = vmul.f32 %v5853_v39, %v1771_v45  ;;  %v4490_v48 = vpop.f32.mrb[3].mxu0 }
 0x21f   : > { %v1851_v49 = vmax.f32 %v1841_v46, 0.0  ;;  %v1842_v50 = vadd.f32 %v5858_v41, %v1825_v47 }
 0x221   : > { %v5864_v51 = vmul.f32 %v1874_v44, %v1851_v49  ;;  %v1852_v52 = vmax.f32 %v1842_v50, 0.0  ;;  %v1904_v50 = vpop.permute.xlu0 %1903 }
 0x222   : > { %v1776_v54 = vpop.f32.mrb[4].mxu0 }
 0x223   : > { %1945 = vst [vmem:[#allocation3 + $0x10] sm:$0xff] %v5864_v51  ;;  %v5867_v55 = vmul.f32 %v1879_v53, %v1852_v52  ;;  %v1826_v56 = vmul.f32 %v5853_v39, %v1776_v54  ;;  %v4493_v57 = vpop.f32.mrb[5].mxu0  ;;  %v5244_v53 = vld [vmem:[%s6409_s5 + $0x20] sm:$0xff]  }
 0x224   : > { %v1779_v59 = vpop.f32.mrb[6].mxu0 }
 0x225   : > { %1946 = vst [vmem:[#allocation3 + $0x18] sm:$0xff] %v5867_v55  ;;  %v1843_v60 = vadd.f32 %v5858_v41, %v1826_v56  ;;  %v1827_v61 = vmul.f32 %v5853_v39, %v1779_v59  ;;  %v4494_v62 = vpop.f32.mrb[7].mxu0  ;;  %v2596_v63 = vpack.c.bf16 %v5867_v55, %v5864_v51  ;;  %v1909_v59 = vpop.permute.xlu1 %1908  ;;  %v5274_v51 = vld [vmem:[%s6409_s5 + $0x150] sm:$0xff]   ;;  %v5275_v55 = vld [vmem:[%s6409_s5 + $0x158] sm:$0xff]  }
 0x227   : > { %v1853_v0 = vmax.f32 %v1843_v60, 0.0  ;;  %v1844_v2 = vadd.f32 %v5858_v41, %v1827_v61 }
 0x229   : > { %v5876_v4 = vmul.f32 %v1884_v58, %v1853_v0  ;;  %v1854_v5 = vmax.f32 %v1844_v2, 0.0 }
 0x22a   : > { %v1784_v7 = vpop.f32.mrb[8].mxu0  ;;  %v1987_v8 = vld [vmem:[#allocation3 + $0xe] sm:$0xff] }
 0x22b   : > { %1947 = vst [vmem:[#allocation3 + $0x20] sm:$0xff] %v5876_v4  ;;  %v5882_v10 = vmul.f32 %v1889_v6, %v1854_v5  ;;  %v4867_v11 = vadd.f32 %v1784_v7, %v660_v26  ;;  %v4497_v12 = vpop.f32.mrb[9].mxu0  ;;  %v1996_v13 = vpack.c.bf16 %v1987_v8, %v1986_v3 }
 0x22c   : > { %v1787_v14 = vpop.f32.mrb[10].mxu0  ;;  %v1988_v26 = vld [vmem:[#allocation3 + $0x16] sm:$0xff]  ;;  %v1914_v12 = vpop.permute.xlu0 %1913 }
 0x22d   : > { %1948 = vst [vmem:[#allocation3 + $0x28] sm:$0xff] %v5882_v10  ;;  %v1828_v15 = vmul.f32 %v4867_v11, %v5853_v39  ;;  %v4868_v16 = vadd.f32 %v1787_v14, %v663_v29  ;;  %v4498_v17 = vpop.f32.mrb[11].mxu0  ;;  %4524 = vmatmul.mubr.bf16.vlgmr.msra.gmra.mrb[12].mxu1 %v1996_v13  ;;  %v2597_v18 = vpack.c.bf16 %v5882_v10, %v5876_v4  ;;  %v5246_v13 = vld [vmem:[%s6409_s5 + $0x30] sm:$0xff]   ;;  %v5276_v4 = vld [vmem:[%s6409_s5 + $0x160] sm:$0xff]   ;;  %v5277_v10 = vld [vmem:[%s6409_s5 + $0x168] sm:$0xff]  }
 0x22e   : > { %4544 = vmatpush3.bf16.msra.mxu1 %v5240_v9  ;;  %4527 = vmatprep.mubr.msk.bf16.mxu1 %vm5319_vm0, %v5628_v1 }
 0x22f   : > { %v1845_v20 = vadd.f32 %v5858_v41, %v1828_v15  ;;  %v1829_v21 = vmul.f32 %v4868_v16, %v5853_v39  ;;  %4545 = vmatprep.subr.bf16.mxu1 %v5628_v1  ;;  %v1919_v15 = vpop.permute.xlu1 %1918 }
 0x231   : > { %v1855_v22 = vmax.f32 %v1845_v20, 0.0  ;;  %v1846_v23 = vadd.f32 %v5858_v41, %v1829_v21 }
 0x232   : > { %v1792_v25 = vpop.f32.mrb[12].mxu0  ;;  %4546 = vmatpush3.bf16.msra.mxu1 %v5241_v19  ;;  %v1989_v27 = vld [vmem:[#allocation3 + $0x1e] sm:$0xff] }
 0x233   : > { %v5900_v29 = vmul.f32 %v1894_v24, %v1855_v22  ;;  %v1856_v30 = vmax.f32 %v1846_v23, 0.0  ;;  %v4869_v32 = vadd.f32 %v1792_v25, %v5842_v31  ;;  %v4501_v34 = vpop.f32.mrb[13].mxu0  ;;  %v1997_v36 = vpack.c.bf16 %v1989_v27, %v1988_v26  ;;  %4547 = vmatprep.subr.bf16.mxu1 %v5628_v1  ;;  %v5243_v31 = vld [vmem:[%s6409_s5 + $0x18] sm:$0xff]   ;;  %v1955_v25 = vld [vmem:[#allocation3 + $0x5] sm:$0xff]  ;;  %v5248_v27 = vld [vmem:[%s6409_s5 + $0x80] sm:$0xff]  }
 0x234   : > { %v1795_v40 = vpop.f32.mrb[14].mxu0  ;;  %v1990_v61 = vld [vmem:[#allocation3 + $0x26] sm:$0xff]  ;;  %v1957_v34 = vld [vmem:[#allocation3 + $0x15] sm:$0xff] }
 0x235   : > { %1949 = vst [vmem:[#allocation3 + $0x30] sm:$0xff] %v5900_v29  ;;  %v5905_v42 = vmul.f32 %v1899_v38, %v1856_v30  ;;  %v1830_v43 = vmul.f32 %v4869_v32, %v5853_v39  ;;  %v4870_v44 = vadd.f32 %v1795_v40, %v5844_v33  ;;  %v4502_v45 = vpop.f32.mrb[15].mxu0  ;;  %4528 = vmatmul.mubr.bf16.gmra.mrb[16].mxu1 %v1997_v36  ;;  %v1956_v26 = vld [vmem:[#allocation3 + $0xd] sm:$0xff]  ;;  %v5249_v30 = vld [vmem:[%s6409_s5 + $0x88] sm:$0xff]  }
 0x236   : > { %4548 = vmatpush3.bf16.msra.mxu1 %v5242_v28  ;;  %4531 = vmatprep.mubr.msk.bf16.mxu1 %vm5319_vm0, %v5628_v1  ;;  %v1965_v28 = vpack.c.bf16 %v1956_v26, %v1955_v25  ;;  %v1958_v32 = vld [vmem:[#allocation3 + $0x1d] sm:$0xff]  ;;  %v5250_v36 = vld [vmem:[%s6409_s5 + $0x90] sm:$0xff]   ;;  %v5251_v40 = vld [vmem:[%s6409_s5 + $0x98] sm:$0xff]  }
 0x237   : > { %1950 = vst [vmem:[#allocation3 + $0x38] sm:$0xff] %v5905_v42  ;;  %v1847_v46 = vadd.f32 %v5858_v41, %v1830_v43  ;;  %v1831_v47 = vmul.f32 %v4870_v44, %v5853_v39  ;;  %4549 = vmatprep.subr.bf16.mxu1 %v5628_v1  ;;  %v2598_v33 = vpack.c.bf16 %v5905_v42, %v5900_v29  ;;  %v1959_v44 = vld [vmem:[#allocation3 + $0x25] sm:$0xff]  ;;  %v5252_v45 = vld [vmem:[%s6409_s5 + $0xa0] sm:$0xff]  }
 0x238   : > { %v1966_v38 = vpack.c.bf16 %v1958_v32, %v1957_v34  ;;  %v5265_v25 = vld [vmem:[%s6409_s5 + $0x108] sm:$0xff]   ;;  %v5266_v26 = vld [vmem:[%s6409_s5 + $0x110] sm:$0xff]  }
 0x239   : > { %v1857_v48 = vmax.f32 %v1847_v46, 0.0  ;;  %v1848_v49 = vadd.f32 %v5858_v41, %v1831_v47  ;;  %v5253_v46 = vld [vmem:[%s6409_s5 + $0xa8] sm:$0xff]   ;;  %v5278_v29 = vld [vmem:[%s6409_s5 + $0x170] sm:$0xff]  }
 0x23a   : > { %v1800_v52 = vpop.f32.mrb[16].mxu0  ;;  %4550 = vmatpush3.bf16.msra.mxu1 %v5243_v31  ;;  %v6073_v34 = vld [vmem:[#allocation3] sm:$0xff] }
 0x23b   : > { %v5924_v54 = vmul.f32 %v1904_v50, %v1857_v48  ;;  %v1858_v56 = vmax.f32 %v1848_v49, 0.0  ;;  %v4871_v57 = vadd.f32 %v1800_v52, %v5846_v35  ;;  %v4505_v58 = vpop.f32.mrb[17].mxu0  ;;  %4551 = vmatprep.subr.bf16.mxu1 %v5628_v1  ;;  %v5245_v35 = vld [vmem:[%s6409_s5 + $0x28] sm:$0xff]   ;;  %v5254_v49 = vld [vmem:[%s6409_s5 + $0xb0] sm:$0xff]   ;;  %v5255_v52 = vld [vmem:[%s6409_s5 + $0xb8] sm:$0xff]  }
 0x23c   : > { %v1803_v60 = vpop.f32.mrb[18].mxu0  ;;  %v1991_v62 = vld [vmem:[#allocation3 + $0x2e] sm:$0xff]  ;;  %v3435_v42 = vld [vmem:[#allocation2 + $0x10e] sm:$0xff] }
 0x23d   : > { %1951 = vst [vmem:[#allocation3 + $0x40] sm:$0xff] %v5924_v54  ;;  %v5929_v0 = vmul.f32 %v1909_v59, %v1858_v56  ;;  %v1832_v2 = vmul.f32 %v4871_v57, %v5853_v39  ;;  %v4872_v3 = vadd.f32 %v1803_v60, %v5848_v37  ;;  %v4506_v5 = vpop.f32.mrb[19].mxu0  ;;  %v1998_v6 = vpack.c.bf16 %v1991_v62, %v1990_v61  ;;  %v1960_v43 = vld [vmem:[#allocation3 + $0x2d] sm:$0xff]  ;;  %v5256_v60 = vld [vmem:[%s6409_s5 + $0xc0] sm:$0xff]   ;;  %v5257_v62 = vld [vmem:[%s6409_s5 + $0xc8] sm:$0xff]  }
 0x23e   : > { %4552 = vmatpush3.bf16.msra.mxu1 %v5244_v53  ;;  %v1992_v16 = vld [vmem:[#allocation3 + $0x36] sm:$0xff]  ;;  %v1967_v31 = vpack.c.bf16 %v1960_v43, %v1959_v44  ;;  %v2260_v58 = vld [vmem:[#allocation3 + $0x7] sm:$0xff] }
 0x23f   : > { %1952 = vst [vmem:[#allocation3 + $0x48] sm:$0xff] %v5929_v0  ;;  %v1849_v7 = vadd.f32 %v5858_v41, %v1832_v2  ;;  %v1833_v8 = vmul.f32 %v4872_v3, %v5853_v39  ;;  %4532 = vmatmul.mubr.bf16.gmra.mrb[20].mxu1 %v1998_v6  ;;  %4553 = vmatprep.subr.bf16.mxu1 %v5628_v1  ;;  %v1961_v48 = vld [vmem:[#allocation3 + $0x35] sm:$0xff]  ;;  %v2263_v2 = vld [vmem:[#allocation3 + $0x1f] sm:$0xff]  ;;  %v5258_v5 = vld [vmem:[%s6409_s5 + $0xd0] sm:$0xff]  }
 0x240   : > { %4535 = vmatprep.mubr.msk.bf16.mxu1 %vm5319_vm0, %v5628_v1  ;;  %v2599_v37 = vpack.c.bf16 %v5929_v0, %v5924_v54  ;;  %v2261_v59 = vld [vmem:[#allocation3 + $0xf] sm:$0xff]  ;;  %v2262_v3 = vld [vmem:[#allocation3 + $0x17] sm:$0xff] }
 0x241   : > { %v1859_v9 = vmax.f32 %v1849_v7, 0.0  ;;  %v1850_v11 = vadd.f32 %v5858_v41, %v1833_v8  ;;  %v5247_v41 = vld [vmem:[%s6409_s5 + $0x38] sm:$0xff]   ;;  %v2270_v61 = vpack.c.bf16 %v2261_v59, %v2260_v58  ;;  %v2271_v6 = vpack.c.bf16 %v2263_v2, %v2262_v3  ;;  %v2264_v8 = vld [vmem:[#allocation3 + $0x27] sm:$0xff]  ;;  %v3438_v0 = vld [vmem:[#allocation2 + $0x126] sm:$0xff] }
 0x242   : > { %4554 = vmatpush3.bf16.msra.mxu1 %v5245_v35  ;;  %v5259_v35 = vld [vmem:[%s6409_s5 + $0xd8] sm:$0xff]  }
 0x243   : > { %v5948_v14 = vmul.f32 %v1914_v12, %v1859_v9  ;;  %v1860_v39 = vmax.f32 %v1850_v11, 0.0  ;;  %4555 = vmatprep.subr.bf16.mxu1 %v5628_v1  ;;  %v2265_v7 = vld [vmem:[#allocation3 + $0x2f] sm:$0xff]  ;;  %v5260_v9 = vld [vmem:[%s6409_s5 + $0xe0] sm:$0xff]   ;;  %v5261_v12 = vld [vmem:[%s6409_s5 + $0xe8] sm:$0xff]  }
 0x244   : > { %v1993_v17 = vld [vmem:[#allocation3 + $0x3e] sm:$0xff]  ;;  %v2272_v11 = vpack.c.bf16 %v2265_v7, %v2264_v8  ;;  %v3437_v54 = vld [vmem:[#allocation2 + $0x11e] sm:$0xff]  ;;  %v2752_v58 = vld [vmem:[#allocation3 + $0x29] sm:$0xff] }
 0x245   : > { %1953 = vst [vmem:[#allocation3 + $0x50] sm:$0xff] %v5948_v14  ;;  %v5952_v19 = vmul.f32 %v1919_v15, %v1860_v39  ;;  %v1999_v20 = vpack.c.bf16 %v1993_v17, %v1992_v16  ;;  %v1962_v47 = vld [vmem:[#allocation3 + $0x3d] sm:$0xff]  ;;  %v5262_v15 = vld [vmem:[%s6409_s5 + $0xf0] sm:$0xff]   ;;  %v5263_v17 = vld [vmem:[%s6409_s5 + $0xf8] sm:$0xff]  }
 0x246   : > { %4556 = vmatpush3.bf16.msra.mxu1 %v5246_v13  ;;  %v1994_v22 = vld [vmem:[#allocation3 + $0x46] sm:$0xff]  ;;  %v1968_v50 = vpack.c.bf16 %v1962_v47, %v1961_v48  ;;  %v2266_v39 = vld [vmem:[#allocation3 + $0x37] sm:$0xff] }
 0x247   : > { %1954 = vst [vmem:[#allocation3 + $0x58] sm:$0xff] %v5952_v19  ;;  %4536 = vmatmul.mubr.bf16.gmra.mrb[24].mxu1 %v1999_v20  ;;  %4557 = vmatprep.subr.bf16.mxu1 %v5628_v1  ;;  %v2600_v21 = vpack.c.bf16 %v5952_v19, %v5948_v14  ;;  %v1963_v56 = vld [vmem:[#allocation3 + $0x45] sm:$0xff]  ;;  %v2435_v32 = vpack.c.bf16 %v2266_v39, %v2265_v7  ;;  %v5279_v48 = vld [vmem:[%s6409_s5 + $0x178] sm:$0xff]   ;;  %v5284_v7 = vld [vmem:[%s6409_s5 + $0x1a0] sm:$0xff]  }
 0x248   : > { %4539 = vmatprep.mubr.msk.bf16.mxu1 %vm5319_vm0, %v5628_v1  ;;  %v2267_v13 = vld [vmem:[#allocation3 + $0x3f] sm:$0xff] }
 0x249   : > { %v2273_v16 = vpack.c.bf16 %v2267_v13, %v2266_v39  ;;  %v5300_v47 = vld [vmem:[%s6412_s8 + $0x8] sm:$0xff]  }
 0x24a   : > { %4558 = vmatpush3.bf16.msra.mxu1 %v5247_v41  ;;  %v2268_v41 = vld [vmem:[#allocation3 + $0x47] sm:$0xff] }
 0x24b   : > { %4579 = vmatprep.subr.bf16.mxu1 %v5628_v1  ;;  %v3439_v19 = vld [vmem:[#allocation2 + $0x12e] sm:$0xff] }
 0x24c   : > { %v1995_v23 = vld [vmem:[#allocation3 + $0x4e] sm:$0xff] }
 0x24d   : > { %v2000_v24 = vpack.c.bf16 %v1995_v23, %v1994_v22  ;;  %v1964_v53 = vld [vmem:[#allocation3 + $0x4d] sm:$0xff]  ;;  %v5264_v23 = vld [vmem:[%s6409_s5 + $0x100] sm:$0xff]  }
 0x24e   : > { %v1969_v57 = vpack.c.bf16 %v1964_v53, %v1963_v56  ;;  %v2269_v20 = vld [vmem:[#allocation3 + $0x4f] sm:$0xff]  ;;  %v2432_v43 = vld [vmem:[#allocation3 + $0x57] sm:$0xff]  ;;  %v5281_v56 = vld [vmem:[%s6409_s5 + $0x188] sm:$0xff]  }
 0x24f   : > { %4540 = vmatmul.mubr.bf16.gmra.mrb[28].mxu1 %v2000_v24  ;;  %v2274_v22 = vpack.c.bf16 %v2269_v20, %v2268_v41  ;;  %v2433_v24 = vpack.c.bf16 %v2262_v3, %v2261_v59  ;;  %v2437_v44 = vpack.c.bf16 %v2432_v43, %v2269_v20  ;;  %v5280_v53 = vld [vmem:[%s6409_s5 + $0x180] sm:$0xff]   ;;  %v2751_v59 = vld [vmem:[#allocation3 + $0x21] sm:$0xff]  ;;  %v5283_v3 = vld [vmem:[%s6409_s5 + $0x198] sm:$0xff]  }
 0x250   : > { %4559 = vmatprep.mubr.msk.bf16.mxu1 %vm5319_vm0, %v5628_v1  ;;  %v2756_v39 = vld [vmem:[#allocation3 + $0x49] sm:$0xff] }
 0x251   : > { %v5287_v20 = vld [vmem:[%s6409_s5 + $0x1b8] sm:$0xff]  }
 0x252   : > { %v5295_v43 = vld [vmem:[%s6409_s5 + $0x1f8] sm:$0xff]  }
 0x257   : > { %4560 = vmatmul.mubr.bf16.vlgmr.msra.gmra.mrb[12].mxu1 %v1965_v28  ;;  %v5267_v28 = vld [vmem:[%s6409_s5 + $0x118] sm:$0xff]  }
 0x258   : > { %4580 = vmatpush3.bf16.msra.mxu1 %v5248_v27  ;;  %4563 = vmatprep.mubr.msk.bf16.mxu1 %vm5319_vm0, %v5628_v1  ;;  %v2434_v27 = vpack.c.bf16 %v2264_v8, %v2263_v2  ;;  %v3442_v2 = vld [vmem:[#allocation2 + $0x146] sm:$0xff] }
 0x259   : > { %4581 = vmatprep.subr.bf16.mxu1 %v5628_v1 }
 0x25c   : > { %4582 = vmatpush3.bf16.msra.mxu1 %v5249_v30  ;;  %v5268_v30 = vld [vmem:[%s6409_s5 + $0x120] sm:$0xff]  }
 0x25d   : > { %4583 = vmatprep.subr.bf16.mxu1 %v5628_v1 }
 0x25f   : > { %4564 = vmatmul.mubr.bf16.gmra.mrb[16].mxu1 %v1966_v38  ;;  %v5270_v38 = vld [vmem:[%s6409_s5 + $0x130] sm:$0xff]  }
 0x260   : > { %4584 = vmatpush3.bf16.msra.mxu1 %v5250_v36  ;;  %4567 = vmatprep.mubr.msk.bf16.mxu1 %vm5319_vm0, %v5628_v1  ;;  %v5269_v36 = vld [vmem:[%s6409_s5 + $0x128] sm:$0xff]  }
 0x261   : > { %4585 = vmatprep.subr.bf16.mxu1 %v5628_v1 }
 0x264   : > { %4586 = vmatpush3.bf16.msra.mxu1 %v5251_v40  ;;  %v2436_v40 = vpack.c.bf16 %v2268_v41, %v2267_v13  ;;  %v2757_v41 = vld [vmem:[#allocation3 + $0x51] sm:$0xff] }
 0x265   : > { %4587 = vmatprep.subr.bf16.mxu1 %v5628_v1 }
 0x267   : > { %4568 = vmatmul.mubr.bf16.gmra.mrb[20].mxu1 %v1967_v31  ;;  %v5272_v31 = vld [vmem:[%s6409_s5 + $0x140] sm:$0xff]  }
 0x268   : > { %4588 = vmatpush3.bf16.msra.mxu1 %v5252_v45  ;;  %4571 = vmatprep.mubr.msk.bf16.mxu1 %vm5319_vm0, %v5628_v1  ;;  %v5297_v45 = vld [vmem:[%s6412_s8] sm:$0xff]  }
 0x269   : > { %4589 = vmatprep.subr.bf16.mxu1 %v5628_v1  ;;  %4832 = vmatpush3.bf16.msra.mxu0 %v5297_v45 }
 0x26a   : > { %4833 = vmatprep.subr.bf16.mxu0 %v6073_v34 }
 0x26c   : > { %4590 = vmatpush3.bf16.msra.mxu1 %v5253_v46  ;;  %v5273_v46 = vld [vmem:[%s6409_s5 + $0x148] sm:$0xff]  }
 0x26d   : > { %4591 = vmatprep.subr.bf16.mxu1 %v5628_v1  ;;  %4834 = vmatpush3.bf16.msra.mxu0 %v5300_v47  ;;  %v5296_v47 = vld [vmem:[%s6409_s5 + $0x200] sm:$0xff]  }
 0x26e   : > { %4835 = vmatprep.subr.bf16.mxu0 %v6073_v34 }
 0x26f   : > { %4572 = vmatmul.mubr.bf16.gmra.mrb[24].mxu1 %v1968_v50  ;;  %v6169_v50 = vld [vmem:[#allocation3 + $0x19] sm:$0xff] }
 0x270   : > { %4592 = vmatpush3.bf16.msra.mxu1 %v5254_v49  ;;  %4575 = vmatprep.mubr.msk.bf16.mxu1 %vm5319_vm0, %v5628_v1 }
 0x271   : > { %4593 = vmatprep.subr.bf16.mxu1 %v5628_v1 }
 0x274   : > { %4594 = vmatpush3.bf16.msra.mxu1 %v5255_v52  ;;  %v2749_v52 = vld [vmem:[#allocation3 + $0x11] sm:$0xff] }
 0x275   : > { %4615 = vmatprep.subr.bf16.mxu1 %v5628_v1  ;;  %v2759_v14 = vpack.c.bf16 %v6169_v50, %v2749_v52 }
 0x277   : > { %4576 = vmatmul.mubr.bf16.gmra.mrb[28].mxu1 %v1969_v57 }
 0x278   : > { %4595 = vmatprep.mubr.msk.bf16.mxu1 %vm5319_vm0, %v5628_v1 }
 0x27f   : > { %4596 = vmatmul.mubr.bf16.vlgmr.msra.gmra.mrb[12].mxu1 %v2270_v61  ;;  %v2760_v61 = vpack.c.bf16 %v2752_v58, %v2751_v59 }
 0x280   : > { %4616 = vmatpush3.bf16.msra.mxu1 %v5256_v60  ;;  %4599 = vmatprep.mubr.msk.bf16.mxu1 %vm5319_vm0, %v5628_v1  ;;  %v5282_v60 = vld [vmem:[%s6409_s5 + $0x190] sm:$0xff]  }
 0x281   : > { %4617 = vmatprep.subr.bf16.mxu1 %v5628_v1 }
 0x284   : > { %4618 = vmatpush3.bf16.msra.mxu1 %v5257_v62  ;;  %v3441_v62 = vld [vmem:[#allocation2 + $0x13e] sm:$0xff] }
 0x285   : > { %4619 = vmatprep.subr.bf16.mxu1 %v5628_v1 }
 0x287   : > { %4600 = vmatmul.mubr.bf16.gmra.mrb[16].mxu1 %v2271_v6  ;;  %v2754_v6 = vld [vmem:[#allocation3 + $0x39] sm:$0xff] }
 0x288   : > { %4620 = vmatpush3.bf16.msra.mxu1 %v5258_v5  ;;  %4603 = vmatprep.mubr.msk.bf16.mxu1 %vm5319_vm0, %v5628_v1  ;;  %v3448_v5 = vpack.c.bf16 %v3442_v2, %v3441_v62  ;;  %v3243_v62 = vld [vmem:[#allocation3 + $0x43] sm:$0xff]  ;;  %v3242_v2 = vld [vmem:[#allocation3 + $0x3b] sm:$0xff] }
 0x289   : > { %4621 = vmatprep.subr.bf16.mxu1 %v5628_v1 }
 0x28c   : > { %4622 = vmatpush3.bf16.msra.mxu1 %v5259_v35  ;;  %v2753_v35 = vld [vmem:[#allocation3 + $0x31] sm:$0xff] }
 0x28d   : > { %4623 = vmatprep.subr.bf16.mxu1 %v5628_v1  ;;  %v2761_v8 = vpack.c.bf16 %v2754_v6, %v2753_v35 }
 0x28f   : > { %4604 = vmatmul.mubr.bf16.gmra.mrb[20].mxu1 %v2272_v11  ;;  %v3444_v11 = vld [vmem:[#allocation2 + $0x156] sm:$0xff] }
 0x290   : > { %4624 = vmatpush3.bf16.msra.mxu1 %v5260_v9  ;;  %4607 = vmatprep.mubr.msk.bf16.mxu1 %vm5319_vm0, %v5628_v1  ;;  %v3443_v9 = vld [vmem:[#allocation2 + $0x14e] sm:$0xff] }
 0x291   : > { %4625 = vmatprep.subr.bf16.mxu1 %v5628_v1  ;;  %v3449_v13 = vpack.c.bf16 %v3444_v11, %v3443_v9 }
 0x294   : > { %4626 = vmatpush3.bf16.msra.mxu1 %v5261_v12  ;;  %v5285_v12 = vld [vmem:[%s6409_s5 + $0x1a8] sm:$0xff]  }
 0x295   : > { %4627 = vmatprep.subr.bf16.mxu1 %v5628_v1 }
 0x297   : > { %4608 = vmatmul.mubr.bf16.gmra.mrb[24].mxu1 %v2273_v16  ;;  %v5286_v16 = vld [vmem:[%s6409_s5 + $0x1b0] sm:$0xff]  }
 0x298   : > { %4628 = vmatpush3.bf16.msra.mxu1 %v5262_v15  ;;  %4611 = vmatprep.mubr.msk.bf16.mxu1 %vm5319_vm0, %v5628_v1  ;;  %v2755_v15 = vld [vmem:[#allocation3 + $0x41] sm:$0xff] }
 0x299   : > { %4629 = vmatprep.subr.bf16.mxu1 %v5628_v1 }
 0x29c   : > { %4630 = vmatpush3.bf16.msra.mxu1 %v5263_v17  ;;  %v2762_v17 = vpack.c.bf16 %v2756_v39, %v2755_v15 }
 0x29d   : > { %4651 = vmatprep.subr.bf16.mxu1 %v5628_v1 }
 0x29f   : > { %4612 = vmatmul.mubr.bf16.gmra.mrb[28].mxu1 %v2274_v22  ;;  %v2758_v22 = vld [vmem:[#allocation3 + $0x59] sm:$0xff] }
 0x2a0   : > { %4631 = vmatprep.mubr.msk.bf16.mxu1 %vm5319_vm0, %v5628_v1 }
 0x2a7   : > { %4632 = vmatmul.mubr.bf16.vlgmr.msra.gmra.mrb[12].mxu1 %v2433_v24  ;;  %v5288_v24 = vld [vmem:[%s6409_s5 + $0x1c0] sm:$0xff]  }
 0x2a8   : > { %4652 = vmatpush3.bf16.msra.mxu1 %v5264_v23  ;;  %4635 = vmatprep.mubr.msk.bf16.mxu1 %vm5319_vm0, %v5628_v1  ;;  %v2763_v23 = vpack.c.bf16 %v2758_v22, %v2757_v41 }
 0x2a9   : > { %4653 = vmatprep.subr.bf16.mxu1 %v5628_v1 }
 0x2ac   : > { %4654 = vmatpush3.bf16.msra.mxu1 %v5265_v25  ;;  %v2922_v25 = vpack.c.bf16 %v2751_v59, %v6169_v50  ;;  %v5305_v50 = vld [vmem:[%s6409_s5 + $0x230] sm:$0xff]   ;;  %v3241_v59 = vld [vmem:[#allocation3 + $0x33] sm:$0xff] }
 0x2ad   : > { %4655 = vmatprep.subr.bf16.mxu1 %v5628_v1 }
 0x2af   : > { %4636 = vmatmul.mubr.bf16.gmra.mrb[16].mxu1 %v2434_v27  ;;  %v5290_v27 = vld [vmem:[%s6409_s5 + $0x1d0] sm:$0xff]  }
 0x2b0   : > { %4656 = vmatpush3.bf16.msra.mxu1 %v5266_v26  ;;  %4639 = vmatprep.mubr.msk.bf16.mxu1 %vm5319_vm0, %v5628_v1  ;;  %v5289_v26 = vld [vmem:[%s6409_s5 + $0x1c8] sm:$0xff]  }
 0x2b1   : > { %4657 = vmatprep.subr.bf16.mxu1 %v5628_v1 }
 0x2b4   : > { %4658 = vmatpush3.bf16.msra.mxu1 %v5267_v28  ;;  %v2923_v28 = vpack.c.bf16 %v2753_v35, %v2752_v58 }
 0x2b5   : > { %4659 = vmatprep.subr.bf16.mxu1 %v5628_v1  ;;  %v5271_v1 = vld [vmem:[%s6409_s5 + $0x138] sm:$0xff]  }
 0x2b7   : > { %4640 = vmatmul.mubr.bf16.gmra.mrb[20].mxu1 %v2435_v32  ;;  %v5292_v32 = vld [vmem:[%s6409_s5 + $0x1e0] sm:$0xff]  }
 0x2b8   : > { %4660 = vmatpush3.bf16.msra.mxu1 %v5268_v30  ;;  %4643 = vmatprep.mubr.msk.bf16.mxu1 %vm5319_vm0, %v6073_v34  ;;  %v5291_v30 = vld [vmem:[%s6409_s5 + $0x1d8] sm:$0xff]  }
 0x2b9   : > { %4661 = vmatprep.subr.bf16.mxu1 %v6073_v34 }
 0x2bc   : > { %4662 = vmatpush3.bf16.msra.mxu1 %v5269_v36  ;;  %v2924_v36 = vpack.c.bf16 %v2755_v15, %v2754_v6  ;;  %v3244_v6 = vld [vmem:[#allocation3 + $0x4b] sm:$0xff] }
 0x2bd   : > { %4663 = vmatprep.subr.bf16.mxu1 %v6073_v34 }
 0x2bf   : > { %4644 = vmatmul.mubr.bf16.gmra.mrb[24].mxu1 %v2436_v40  ;;  %v5294_v40 = vld [vmem:[%s6409_s5 + $0x1f0] sm:$0xff]  }
 0x2c0   : > { %4664 = vmatpush3.bf16.msra.mxu1 %v5270_v38  ;;  %4647 = vmatprep.mubr.msk.bf16.mxu1 %vm5319_vm0, %v6073_v34  ;;  %v5293_v38 = vld [vmem:[%s6409_s5 + $0x1e8] sm:$0xff]  }
 0x2c1   : > { %4665 = vmatprep.subr.bf16.mxu1 %v6073_v34 }
 0x2c4   : > { %4666 = vmatpush3.bf16.msra.mxu1 %v5271_v1  ;;  %v2925_v1 = vpack.c.bf16 %v2757_v41, %v2756_v39 }
 0x2c5   : > { %4687 = vmatprep.subr.bf16.mxu1 %v6073_v34 }
 0x2c7   : > { %4648 = vmatmul.mubr.bf16.gmra.mrb[28].mxu1 %v2437_v44  ;;  %v2921_v44 = vld [vmem:[#allocation3 + $0x61] sm:$0xff] }
 0x2c8   : > { %4667 = vmatprep.mubr.msk.bf16.mxu1 %vm5319_vm0, %v6073_v34  ;;  %v2926_v45 = vpack.c.bf16 %v2921_v44, %v2758_v22 }
 0x2cf   : > { %4668 = vmatmul.mubr.bf16.vlgmr.msra.gmra.mrb[12].mxu1 %v2596_v63  ;;  %v5303_v63 = vld [vmem:[%s6412_s8 + $0x10] sm:$0xff]  }
 0x2d0   : > { %4688 = vmatpush3.bf16.msra.mxu1 %v5272_v31  ;;  %4671 = vmatprep.mubr.msk.bf16.mxu1 %vm5319_vm0, %v6073_v34  ;;  %v3076_v31 = vld [vmem:[#allocation3 + $0x22] sm:$0xff] }
 0x2d1   : > { %4689 = vmatprep.subr.bf16.mxu1 %v6073_v34  ;;  %4836 = vmatpush3.bf16.msra.mxu0 %v5303_v63  ;;  %v3078_v63 = vld [vmem:[#allocation3 + $0x32] sm:$0xff] }
 0x2d2   : > { %4837 = vmatprep.subr.bf16.mxu0 %v6073_v34 }
 0x2d4   : > { %4690 = vmatpush3.bf16.msra.mxu1 %v5273_v46  ;;  %v3075_v46 = vld [vmem:[#allocation3 + $0x1a] sm:$0xff] }
 0x2d5   : > { %4691 = vmatprep.subr.bf16.mxu1 %v6073_v34 }
 0x2d7   : > { %4672 = vmatmul.mubr.bf16.gmra.mrb[16].mxu1 %v2597_v18  ;;  %v5306_v18 = vld [vmem:[%s6412_s8 + $0x18] sm:$0xff]  }
 0x2d8   : > { %4692 = vmatpush3.bf16.msra.mxu1 %v5274_v51  ;;  %4675 = vmatprep.mubr.msk.bf16.mxu1 %vm5319_vm0, %v6073_v34  ;;  %v3085_v51 = vpack.c.bf16 %v3076_v31, %v3075_v46 }
 0x2d9   : > { %4693 = vmatprep.subr.bf16.mxu1 %v6073_v34  ;;  %4838 = vmatpush3.bf16.msra.mxu0 %v5306_v18 }
 0x2dc   : > { %4694 = vmatpush3.bf16.msra.mxu1 %v5275_v55  ;;  %v5298_v55 = vld [vmem:[%s6409_s5 + $0x208] sm:$0xff]  }
 0x2dd   : > { %4695 = vmatprep.subr.bf16.mxu1 %v6073_v34 }
 0x2df   : > { %4676 = vmatmul.mubr.bf16.gmra.mrb[20].mxu1 %v2598_v33  ;;  %v3436_v33 = vld [vmem:[#allocation2 + $0x116] sm:$0xff] }
 0x2e0   : > { %4696 = vmatpush3.bf16.msra.mxu1 %v5276_v4  ;;  %4679 = vmatprep.mubr.msk.bf16.mxu1 %vm5319_vm0, %v6073_v34  ;;  %v3445_v49 = vpack.c.bf16 %v3436_v33, %v3435_v42  ;;  %v3077_v4 = vld [vmem:[#allocation3 + $0x2a] sm:$0xff]  ;;  %v3080_v42 = vld [vmem:[#allocation3 + $0x42] sm:$0xff]  ;;  %v3079_v33 = vld [vmem:[#allocation3 + $0x3a] sm:$0xff] }
 0x2e1   : > { %4697 = vmatprep.subr.bf16.mxu1 %v6073_v34  ;;  %v3086_v18 = vpack.c.bf16 %v3078_v63, %v3077_v4 }
 0x2e2   : > { %4840 = vmatmul.mubr.msk.bf16.vlgmr.msra.gmra.mrb[20].mxu0 %vm478_vm1, %v3445_v49  ;;  %v3087_v49 = vpack.c.bf16 %v3080_v42, %v3079_v33 }
 0x2e3   : > { %4843 = vmatprep.mubr.msk.bf16.mxu0 %vm5319_vm0, %v6073_v34 }
 0x2e4   : > { %4698 = vmatpush3.bf16.msra.mxu1 %v5277_v10  ;;  %v5299_v10 = vld [vmem:[%s6409_s5 + $0x210] sm:$0xff]  }
 0x2e5   : > { %4699 = vmatprep.subr.bf16.mxu1 %v6073_v34 }
 0x2e7   : > { %4680 = vmatmul.mubr.bf16.gmra.mrb[24].mxu1 %v2599_v37  ;;  %v3446_v37 = vpack.c.bf16 %v3438_v0, %v3437_v54  ;;  %v5304_v54 = vld [vmem:[%s6409_s5 + $0x228] sm:$0xff]   ;;  %v3082_v0 = vld [vmem:[#allocation3 + $0x52] sm:$0xff] }
 0x2e8   : > { %4700 = vmatpush3.bf16.msra.mxu1 %v5278_v29  ;;  %4683 = vmatprep.mubr.msk.bf16.mxu1 %vm5319_vm0, %v6073_v34  ;;  %v5301_v29 = vld [vmem:[%s6409_s5 + $0x218] sm:$0xff]  }
 0x2e9   : > { %4701 = vmatprep.subr.bf16.mxu1 %v6073_v34 }
 0x2ea   : > { %4844 = vmatmul.mubr.msk.bf16.gmra.mrb[24].mxu0 %vm478_vm1, %v3446_v37  ;;  %v3081_v37 = vld [vmem:[#allocation3 + $0x4a] sm:$0xff] }
 0x2eb   : > { %4847 = vmatprep.mubr.msk.bf16.mxu0 %vm5319_vm0, %v6073_v34  ;;  %v3088_v52 = vpack.c.bf16 %v3082_v0, %v3081_v37 }
 0x2ec   : > { %4702 = vmatpush3.bf16.msra.mxu1 %v5279_v48  ;;  %v5302_v48 = vld [vmem:[%s6409_s5 + $0x220] sm:$0xff]  }
 0x2ed   : > { %4723 = vmatprep.subr.bf16.mxu1 %v6073_v34 }
 0x2ef   : > { %4684 = vmatmul.mubr.bf16.gmra.mrb[28].mxu1 %v2600_v21  ;;  %v3440_v21 = vld [vmem:[#allocation2 + $0x136] sm:$0xff] }
 0x2f0   : > { %4703 = vmatprep.mubr.msk.bf16.mxu1 %vm5319_vm0, %v6073_v34  ;;  %v3447_v57 = vpack.c.bf16 %v3440_v21, %v3439_v19  ;;  %v3084_v19 = vld [vmem:[#allocation3 + $0x62] sm:$0xff] }
 0x2f2   : > { %4848 = vmatmul.mubr.msk.bf16.gmra.mrb[28].mxu0 %vm478_vm1, %v3447_v57  ;;  %v3238_v57 = vld [vmem:[#allocation3 + $0x1b] sm:$0xff] }
 0x2f3   : > { %4851 = vmatprep.mubr.msk.bf16.mxu0 %vm5319_vm0, %v6073_v34 }
 0x2f7   : > { %4704 = vmatmul.mubr.bf16.vlgmr.msra.gmra.mrb[12].mxu1 %v2759_v14  ;;  %v3083_v14 = vld [vmem:[#allocation3 + $0x5a] sm:$0xff] }
 0x2f8   : > { %4724 = vmatpush3.bf16.msra.mxu1 %v5280_v53  ;;  %4707 = vmatprep.mubr.msk.bf16.mxu1 %vm5319_vm0, %v6073_v34  ;;  %v5307_v53 = vld [vmem:[%s6409_s5 + $0x238] sm:$0xff]   ;;  %v3089_v21 = vpack.c.bf16 %v3084_v19, %v3083_v14 }
 0x2f9   : > { %4725 = vmatprep.subr.bf16.mxu1 %v6073_v34 }
 0x2fa   : > { %4852 = vmatmul.mubr.msk.bf16.gmra.mrb[32].mxu0 %vm478_vm1, %v3448_v5  ;;  %v3245_v5 = vld [vmem:[#allocation3 + $0x53] sm:$0xff] }
 0x2fb   : > { %4855 = vmatprep.mubr.msk.bf16.mxu0 %vm5319_vm0, %v6073_v34  ;;  %v3251_v35 = vpack.c.bf16 %v3245_v5, %v3244_v6 }
 0x2fc   : > { %4726 = vmatpush3.bf16.msra.mxu1 %v5281_v56  ;;  %v3239_v56 = vld [vmem:[#allocation3 + $0x23] sm:$0xff] }
 0x2fd   : > { %4727 = vmatprep.subr.bf16.mxu1 %v6073_v34  ;;  %v3248_v58 = vpack.c.bf16 %v3239_v56, %v3238_v57 }
 0x2ff   : > { %4708 = vmatmul.mubr.bf16.gmra.mrb[16].mxu1 %v2760_v61 }
 0x300   : > { %4728 = vmatpush3.bf16.msra.mxu1 %v5282_v60  ;;  %4711 = vmatprep.mubr.msk.bf16.mxu1 %vm5319_vm0, %v6073_v34  ;;  %v3240_v60 = vld [vmem:[#allocation3 + $0x2b] sm:$0xff] }
 0x301   : > { %4729 = vmatprep.subr.bf16.mxu1 %v6073_v34  ;;  %v3249_v61 = vpack.c.bf16 %v3241_v59, %v3240_v60 }
 0x302   : > { %4856 = vmatmul.mubr.msk.bf16.gmra.mrb[36].mxu0 %vm478_vm1, %v3449_v13 }
 0x304   : > { %4730 = vmatpush3.bf16.msra.mxu1 %v5283_v3  ;;  %v3250_v3 = vpack.c.bf16 %v3243_v62, %v3242_v2 }
 0x305   : > { %4731 = vmatprep.subr.bf16.mxu1 %v6073_v34 }
 0x307   : > { %4712 = vmatmul.mubr.bf16.gmra.mrb[20].mxu1 %v2761_v8  ;;  %v3247_v8 = vld [vmem:[#allocation3 + $0x63] sm:$0xff] }
 0x308   : > { %4732 = vmatpush3.bf16.msra.mxu1 %v5284_v7  ;;  %4715 = vmatprep.mubr.msk.bf16.mxu1 %vm5319_vm0, %v6073_v34  ;;  %v3246_v7 = vld [vmem:[#allocation3 + $0x5b] sm:$0xff] }
 0x309   : > { %4733 = vmatprep.subr.bf16.mxu1 %v6073_v34  ;;  %v3252_v9 = vpack.c.bf16 %v3247_v8, %v3246_v7 }
 0x30c   : > { %4734 = vmatpush3.bf16.msra.mxu1 %v5285_v12 }
 0x30d   : > { %4735 = vmatprep.subr.bf16.mxu1 %v6073_v34 }
 0x30f   : > { %4716 = vmatmul.mubr.bf16.gmra.mrb[24].mxu1 %v2762_v17 }
 0x310   : > { %4736 = vmatpush3.bf16.msra.mxu1 %v5286_v16  ;;  %4719 = vmatprep.mubr.msk.bf16.mxu1 %vm5319_vm0, %v6073_v34 }
 0x311   : > { %4737 = vmatprep.subr.bf16.mxu1 %v6073_v34 }
 0x314   : > { %4738 = vmatpush3.bf16.msra.mxu1 %v5287_v20 }
 0x315   : > { %4759 = vmatprep.subr.bf16.mxu1 %v6073_v34 }
 0x317   : > { %4720 = vmatmul.mubr.bf16.gmra.mrb[28].mxu1 %v2763_v23 }
 0x318   : > { %4739 = vmatprep.mubr.msk.bf16.mxu1 %vm5319_vm0, %v6073_v34 }
 0x31f   : > { %4740 = vmatmul.mubr.bf16.vlgmr.msra.gmra.mrb[12].mxu1 %v2922_v25 }
 0x320   : > { %4760 = vmatpush3.bf16.msra.mxu1 %v5288_v24  ;;  %4743 = vmatprep.mubr.msk.bf16.mxu1 %vm5319_vm0, %v6073_v34 }
 0x321   : > { %4761 = vmatprep.subr.bf16.mxu1 %v6073_v34 }
 0x324   : > { %4762 = vmatpush3.bf16.msra.mxu1 %v5289_v26 }
 0x325   : > { %4763 = vmatprep.subr.bf16.mxu1 %v6073_v34 }
 0x327   : > { %4744 = vmatmul.mubr.bf16.gmra.mrb[16].mxu1 %v2923_v28 }
 0x328   : > { %4764 = vmatpush3.bf16.msra.mxu1 %v5290_v27  ;;  %4747 = vmatprep.mubr.msk.bf16.mxu1 %vm5319_vm0, %v6073_v34 }
 0x329   : > { %4765 = vmatprep.subr.bf16.mxu1 %v6073_v34 }
 0x32c   : > { %4766 = vmatpush3.bf16.msra.mxu1 %v5291_v30 }
 0x32d   : > { %4767 = vmatprep.subr.bf16.mxu1 %v6073_v34 }
 0x32f   : > { %4748 = vmatmul.mubr.bf16.gmra.mrb[20].mxu1 %v2924_v36 }
 0x330   : > { %4768 = vmatpush3.bf16.msra.mxu1 %v5292_v32  ;;  %4751 = vmatprep.mubr.msk.bf16.mxu1 %vm5319_vm0, %v6073_v34 }
 0x331   : > { %4769 = vmatprep.subr.bf16.mxu1 %v6073_v34 }
 0x334   : > { %4770 = vmatpush3.bf16.msra.mxu1 %v5293_v38  ;;  %v6325_v38 = vld [vmem:[%s6413_s9] ss:$0 sm:$0xff] }
 0x335   : > { %4771 = vmatprep.subr.bf16.mxu1 %v6073_v34 }
 0x337   : > { %4752 = vmatmul.mubr.bf16.gmra.mrb[24].mxu1 %v2925_v1  ;;  %v6331_v1 = vld [vmem:[%s6414_s10] ss:$0 sm:$0xff] }
 0x338   : > { %4772 = vmatpush3.bf16.msra.mxu1 %v5294_v40  ;;  %4755 = vmatprep.mubr.msk.bf16.mxu1 %vm5319_vm0, %v6073_v34 }
 0x339   : > { %4773 = vmatprep.subr.bf16.mxu1 %v6073_v34 }
 0x33c   : > { %4774 = vmatpush3.bf16.msra.mxu1 %v5295_v43  ;;  %v6336_v43 = vld [vmem:[%s6410_s6] ss:$0 sm:$0xff] }
 0x33d   : > { %4795 = vmatprep.subr.bf16.mxu1 %v6073_v34 }
 0x33f   : > { %4756 = vmatmul.mubr.bf16.gmra.mrb[28].mxu1 %v2926_v45  ;;  %v6342_v45 = vld [vmem:[%s6411_s7] ss:$0 sm:$0xff] }
 0x340   : > { %4775 = vmatprep.mubr.msk.bf16.mxu1 %vm5319_vm0, %v6073_v34 }
 0x347   : > { %4776 = vmatmul.mubr.bf16.vlgmr.msra.gmra.mrb[12].mxu1 %v3085_v51 }
 0x348   : > { %4796 = vmatpush3.bf16.msra.mxu1 %v5296_v47  ;;  %4779 = vmatprep.mubr.msk.bf16.mxu1 %vm5319_vm0, %v6073_v34 }
 0x349   : > { %4797 = vmatprep.subr.bf16.mxu1 %v6073_v34 }
 0x34c   : > { %4798 = vmatpush3.bf16.msra.mxu1 %v5298_v55 }
 0x34d   : > { %4799 = vmatprep.subr.bf16.mxu1 %v6073_v34 }
 0x34f   : > { %4780 = vmatmul.mubr.bf16.gmra.mrb[16].mxu1 %v3086_v18 }
 0x350   : > { %4800 = vmatpush3.bf16.msra.mxu1 %v5299_v10  ;;  %4783 = vmatprep.mubr.msk.bf16.mxu1 %vm5319_vm0, %v6073_v34 }
 0x351   : > { %4801 = vmatprep.subr.bf16.mxu1 %v6073_v34 }
 0x354   : > { %4802 = vmatpush3.bf16.msra.mxu1 %v5301_v29 }
 0x355   : > { %4803 = vmatprep.subr.bf16.mxu1 %v6073_v34 }
 0x357   : > { %4784 = vmatmul.mubr.bf16.gmra.mrb[20].mxu1 %v3087_v49 }
 0x358   : > { %4804 = vmatpush3.bf16.msra.mxu1 %v5302_v48  ;;  %4787 = vmatprep.mubr.msk.bf16.mxu1 %vm5319_vm0, %v6073_v34 }
 0x359   : > { %4805 = vmatprep.subr.bf16.mxu1 %v6073_v34 }
 0x35c   : > { %4806 = vmatpush3.bf16.msra.mxu1 %v5304_v54 }
 0x35d   : > { %4807 = vmatprep.subr.bf16.mxu1 %v6073_v34 }
 0x35f   : > { %4788 = vmatmul.mubr.bf16.gmra.mrb[24].mxu1 %v3088_v52 }
 0x360   : > { %4808 = vmatpush3.bf16.msra.mxu1 %v5305_v50  ;;  %4791 = vmatprep.mubr.msk.bf16.mxu1 %vm5319_vm0, %v6073_v34 }
 0x361   : > { %4809 = vmatprep.subr.bf16.mxu1 %v6073_v34 }
 0x364   : > { %4810 = vmatpush3.bf16.msra.mxu1 %v5307_v53 }
 0x367   : > { %4792 = vmatmul.mubr.bf16.gmra.mrb[28].mxu1 %v3089_v21 }
 0x368   : > { %4811 = vmatprep.mubr.msk.bf16.mxu1 %vm5319_vm0, %v6073_v34 }
 0x36f   : > { %4812 = vmatmul.mubr.bf16.vlgmr.msra.gmra.mrb[12].mxu1 %v3248_v58 }
 0x370   : > { %4815 = vmatprep.mubr.msk.bf16.mxu1 %vm5319_vm0, %v6073_v34 }
 0x377   : > { %4816 = vmatmul.mubr.bf16.gmra.mrb[16].mxu1 %v3249_v61 }
 0x378   : > { %4819 = vmatprep.mubr.msk.bf16.mxu1 %vm5319_vm0, %v6073_v34 }
 0x37f   : > { %4820 = vmatmul.mubr.bf16.gmra.mrb[20].mxu1 %v3250_v3 }
 0x380   : > { %4823 = vmatprep.mubr.msk.bf16.mxu1 %vm5319_vm0, %v6073_v34 }
 0x387   : > { %4824 = vmatmul.mubr.bf16.gmra.mrb[24].mxu1 %v3251_v35 }
 0x388   : > { %4827 = vmatprep.mubr.msk.bf16.mxu1 %vm5319_vm0, %v6073_v34 }
 0x38f   : > { %4828 = vmatmul.mubr.bf16.gmra.mrb[28].mxu1 %v3252_v9 }
 0x3b5   : > { %v3531_v11 = vpop.f32.mrb[20].mxu0 }
 0x3b6   : > { %v4841_v12 = vpop.f32.mrb[21].mxu0  ;;  %v3577_v40 = vmul.f32 %v6325_v38, %v3531_v11 }
 0x3b7   : > { %v3534_v13 = vpop.f32.mrb[22].mxu0 }
 0x3b8   : > { %v4842_v39 = vpop.f32.mrb[23].mxu0  ;;  %v3594_v31 = vadd.f32 %v6331_v1, %v3577_v40  ;;  %v3578_v46 = vmul.f32 %v6325_v38, %v3534_v13 }
 0x3ba   : > { %v3595_v18 = vadd.f32 %v6331_v1, %v3578_v46 }
 0x3bd   : > { %v3539_v15 = vpop.f32.mrb[24].mxu0 }
 0x3be   : > { %v4845_v16 = vpop.f32.mrb[25].mxu0  ;;  %v3579_v33 = vmul.f32 %v6325_v38, %v3539_v15 }
 0x3bf   : > { %v3542_v17 = vpop.f32.mrb[26].mxu0 }
 0x3c0   : > { %v4846_v20 = vpop.f32.mrb[27].mxu0  ;;  %v3596_v54 = vadd.f32 %v6331_v1, %v3579_v33  ;;  %v3580_v0 = vmul.f32 %v6325_v38, %v3542_v17 }
 0x3c2   : > { %v3597_v21 = vadd.f32 %v6331_v1, %v3580_v0 }
 0x3c5   : > { %v3547_v41 = vpop.f32.mrb[28].mxu0 }
 0x3c6   : > { %v4849_v22 = vpop.f32.mrb[29].mxu0  ;;  %v3581_v58 = vmul.f32 %v6325_v38, %v3547_v41 }
 0x3c7   : > { %v3550_v23 = vpop.f32.mrb[30].mxu0 }
 0x3c8   : > { %v4850_v24 = vpop.f32.mrb[31].mxu0  ;;  %v3598_v61 = vadd.f32 %v6331_v1, %v3581_v58  ;;  %v3582_v62 = vmul.f32 %v6325_v38, %v3550_v23 }
 0x3ca   : > { %v3599_v8 = vadd.f32 %v6331_v1, %v3582_v62 }
 0x3cd   : > { %v3555_v25 = vpop.f32.mrb[32].mxu0 }
 0x3ce   : > { %v4853_v26 = vpop.f32.mrb[33].mxu0  ;;  %v3583_v12 = vmul.f32 %v6325_v38, %v3555_v25 }
 0x3cf   : > { %v6316_v34 = vpop.f32.mrb[34].mxu0 }
 0x3d0   : > { %v4854_v27 = vpop.f32.mrb[35].mxu0  ;;  %v3600_v15 = vadd.f32 %v6331_v1, %v3583_v12  ;;  %v3584_v16 = vmul.f32 %v6325_v38, %v6316_v34 }
 0x3d2   : > { %v3601_v25 = vadd.f32 %v6331_v1, %v3584_v16 }
 0x3d5   : > { %v6318_v28 = vpop.f32.mrb[36].mxu0 }
 0x3d6   : > { %v4857_v30 = vpop.f32.mrb[37].mxu0 }
 0x3d7   : > { %v6320_v32 = vpop.f32.mrb[38].mxu0  ;;  %v3585_v30 = vmul.f32 %v6325_v38, %v6318_v28 }
 0x3d8   : > { %v4858_v36 = vpop.f32.mrb[39].mxu0 }
 0x3d9   : > { %v3602_v40 = vadd.f32 %v6331_v1, %v3585_v30 }
 0x442   : > { %v3352_v44 = vpop.f32.mrb[12].mxu1 }
 0x443   : > { %v3408_v47 = vmul.f32 %v6336_v43, %v3352_v44  ;;  %v4813_v51 = vpop.f32.mrb[13].mxu1  ;;  %v3586_v44 = vmul.f32 %v6325_v38, %v6320_v32 }
 0x444   : > { %v3355_v55 = vpop.f32.mrb[14].mxu1 }
 0x445   : > { %v3425_v63 = vadd.f32 %v6342_v45, %v3408_v47  ;;  %v3409_v4 = vmul.f32 %v6336_v43, %v3355_v55  ;;  %v4814_v10 = vpop.f32.mrb[15].mxu1 }
 0x447   : > { %v3604_v29 = vadd.f32 %v3594_v31, %v3425_v63  ;;  %v3426_v42 = vadd.f32 %v6342_v45, %v3409_v4  ;;  %v3603_v63 = vadd.f32 %v6331_v1, %v3586_v44 }
 0x449   : > { %3614 = vst [vmem:[%s6352_s27] sm:$0xff] %v3604_v29  ;;  %v3605_v48 = vadd.f32 %v3595_v18, %v3426_v42 }
 0x44a   : > { %v3360_v49 = vpop.f32.mrb[16].mxu1 }
 0x44b   : > { %3615 = vst [vmem:[%s6352_s27 + $0x8] sm:$0xff] %v3605_v48  ;;  %v3410_v37 = vmul.f32 %v6336_v43, %v3360_v49  ;;  %v4817_v50 = vpop.f32.mrb[17].mxu1 }
 0x44c   : > { %v3363_v52 = vpop.f32.mrb[18].mxu1 }
 0x44d   : > { %v3427_v53 = vadd.f32 %v6342_v45, %v3410_v37  ;;  %v3411_v14 = vmul.f32 %v6336_v43, %v3363_v52  ;;  %v4818_v19 = vpop.f32.mrb[19].mxu1 }
 0x44f   : > { %v3606_v56 = vadd.f32 %v3596_v54, %v3427_v53  ;;  %v3428_v57 = vadd.f32 %v6342_v45, %v3411_v14 }
 0x451   : > { %3616 = vst [vmem:[%s6352_s27 + $0x10] sm:$0xff] %v3606_v56  ;;  %v3607_v59 = vadd.f32 %v3597_v21, %v3428_v57 }
 0x452   : > { %v3368_v60 = vpop.f32.mrb[20].mxu1 }
 0x453   : > { %3617 = vst [vmem:[%s6352_s27 + $0x18] sm:$0xff] %v3607_v59  ;;  %v3412_v2 = vmul.f32 %v6336_v43, %v3368_v60  ;;  %v4821_v3 = vpop.f32.mrb[21].mxu1 }
 0x454   : > { %v3371_v5 = vpop.f32.mrb[22].mxu1 }
 0x455   : > { %v3429_v6 = vadd.f32 %v6342_v45, %v3412_v2  ;;  %v3413_v35 = vmul.f32 %v6336_v43, %v3371_v5  ;;  %v4822_v7 = vpop.f32.mrb[23].mxu1 }
 0x457   : > { %v3608_v9 = vadd.f32 %v3598_v61, %v3429_v6  ;;  %v3430_v11 = vadd.f32 %v6342_v45, %v3413_v35 }
 0x459   : > { %3618 = vst [vmem:[%s6352_s27 + $0x20] sm:$0xff] %v3608_v9  ;;  %v3609_v13 = vadd.f32 %v3599_v8, %v3430_v11 }
 0x45a   : > { %v3376_v39 = vpop.f32.mrb[24].mxu1 }
 0x45b   : > { %3619 = vst [vmem:[%s6352_s27 + $0x28] sm:$0xff] %v3609_v13  ;;  %v3414_v17 = vmul.f32 %v6336_v43, %v3376_v39  ;;  %v4825_v20 = vpop.f32.mrb[25].mxu1 }
 0x45c   : > { %v3379_v41 = vpop.f32.mrb[26].mxu1 }
 0x45d   : > { %v3431_v22 = vadd.f32 %v6342_v45, %v3414_v17  ;;  %v3415_v23 = vmul.f32 %v6336_v43, %v3379_v41  ;;  %v4826_v24 = vpop.f32.mrb[27].mxu1 }
 0x45f   : > { %v3610_v26 = vadd.f32 %v3600_v15, %v3431_v22  ;;  %v3432_v27 = vadd.f32 %v6342_v45, %v3415_v23 }
 0x461   : > { %3620 = vst [vmem:[%s6352_s27 + $0x30] sm:$0xff] %v3610_v26  ;;  %v3611_v34 = vadd.f32 %v3601_v25, %v3432_v27 }
 0x462   : > { %v3384_v36 = vpop.f32.mrb[28].mxu1 }
 0x463   : > { %3621 = vst [vmem:[%s6352_s27 + $0x38] sm:$0xff] %v3611_v34  ;;  %v3416_v31 = vmul.f32 %v6336_v43, %v3384_v36  ;;  %v4829_v46 = vpop.f32.mrb[29].mxu1 }
 0x464   : > { %v3387_v47 = vpop.f32.mrb[30].mxu1 }
 0x465   : > { %v3433_v51 = vadd.f32 %v6342_v45, %v3416_v31  ;;  %v3417_v55 = vmul.f32 %v6336_v43, %v3387_v47  ;;  %v4830_v28 = vpop.f32.mrb[31].mxu1 }
 0x467   : > { %v3612_v4 = vadd.f32 %v3602_v40, %v3433_v51  ;;  %v3434_v10 = vadd.f32 %v6342_v45, %v3417_v55 }
 0x469   : > { %3622 = vst [vmem:[%s6352_s27 + $0x40] sm:$0xff] %v3612_v4  ;;  %v3613_v18 = vadd.f32 %v3603_v63, %v3434_v10 }
 0x46b   : > { %3623 = vst [vmem:[%s6352_s27 + $0x48] sm:$0xff] %v3613_v18 }
 0x46c PF: > { %s21_s17 = sadd.s32 1, %s5316_s17  }
 0x46d   : > { %p18_p4 = scmp.ge.s32.totalorder %s21_s17, 4  }
 0x46f   :  { %20 = sbr.rel (!%p18_p4) target bundleno = 1 (0x1), region = 110 }

</bundles_post_ra>
